<compile_context>
chip_gen: v7x
topology: tpu7x:2x2x1
jax: 0.10.0
libtpu: 0.0.40
codegen_flags: <defaults>
</compile_context>

<pallas_src>
import functools

import jax
import jax.numpy as jnp
from jax.experimental import pallas as pl
from jax.experimental.pallas import tpu as pltpu

EPS = 1e-8   # LayerNorm(eps=1e-08) in the PyTorch module


def _layernorm(y, w, b):
    mean = jnp.mean(y, axis=-1, keepdims=True)
    var = jnp.mean((y - mean) ** 2, axis=-1, keepdims=True)
    return (y - mean) * jax.lax.rsqrt(var + EPS) * w + b


def _softmax_last(x):
    # kernel-side softmax: EUP approximate reciprocal instead of a VALU divide
    m = jnp.max(x, axis=-1, keepdims=True)
    e = jnp.exp(x - m)
    return e * pl.reciprocal(jnp.sum(e, axis=-1, keepdims=True), approx=True)


# ---------------------------------------------------------------------------
# Kernel 1: grid = (head, query_tile).  Attention + per-head FFN branch fused.
# ---------------------------------------------------------------------------
def moe_head_ffn_kernel(x_ref, wh_ref, bh_ref, wqkv_ref, wg_ref, bg_ref,
                        lnw_ref, lnb_ref, fcw_ref, fcb_ref, fc2w_ref, fc2b_ref,
                        flnw_ref, flnb_ref,
                        out_ref,
                        split_ref, k_ref, v_ref, q_ref,
                        *, n_expert, head_unit, q_tile):
    i = pl.program_id(0)                       # head index
    qi = pl.program_id(1)                      # query-tile index
    U = head_unit
    E = n_expert
    B = split_ref.shape[0]
    S = split_ref.shape[1]
    qs = pl.multiple_of(qi * q_tile, q_tile)
    bf16 = jnp.bfloat16

    # ---- once per head: head projection + fused (K | V | Q_all) GEMM ------
    @pl.when(qi == 0)
    def _():
        x = x_ref[...]                                             # (B,S,hidden) f32
        split_x = jnp.einsum('bsh,uh->bsu', x.astype(bf16), wh_ref[0],
                             preferred_element_type=jnp.float32) + bh_ref[0]
        split_ref[...] = split_x                                   # f32 (pad mask/residual)
        proj = jnp.einsum('bsu,vu->bsv', split_x.astype(bf16), wqkv_ref[0],
                          preferred_element_type=jnp.float32)      # (B,S,(2+E)*U)
        k_ref[...] = proj[:, :, 0:U].astype(bf16)
        v_ref[...] = proj[:, :, U:2 * U].astype(bf16)
        q_ref[...] = proj[:, :, 2 * U:].astype(bf16)

    # ---- this query tile ---------------------------------------------------
    split_q = split_ref[:, pl.ds(qs, q_tile), :]                   # (B,tq,U) f32
    pad = split_q == 0.0                                           # PyTorch padding quirk
    k = k_ref[...]                                                 # (B,S,U) bf16
    v = v_ref[...]                                                 # (B,S,U) bf16
    q_all = q_ref[:, pl.ds(qs, q_tile), :]                         # (B,tq,E*U) bf16

    # causal mask built in-kernel (replaces the (S,S) fp32 HBM mask)
    row = jax.lax.broadcasted_iota(jnp.int32, (q_tile, S), 0) + qs
    col = jax.lax.broadcasted_iota(jnp.int32, (q_tile, S), 1)
    mask = jnp.where(col > row, jnp.float32(-jnp.inf), jnp.float32(0.0))

    scale = head_unit ** 0.5                   # NB: the PyTorch code MULTIPLIES by sqrt(U)
    wg = wg_ref[0]                                                 # (E,E,U) bf16
    bg = bg_ref[0]                                                 # (1,E)   f32

    expert_outs = []
    gate_logits = jnp.zeros((B, q_tile, E), jnp.float32)
    for j in range(E):
        qj = q_all[:, :, j * U:(j + 1) * U]                        # (B,tq,U) bf16
        qk = jnp.einsum('bqu,bku->bqk', qj, k,
                        preferred_element_type=jnp.float32)        # (B,tq,S)
        qk = qk * scale + mask
        score = _softmax_last(qk)
        qkv = jnp.einsum('bqk,bku->bqu', score.astype(bf16), v,
                         preferred_element_type=jnp.float32)
        qkv = jnp.where(pad, 0.0, qkv)
        expert_outs.append(qkv)
        # accumulate gate logits expert-by-expert (no concat of expert outputs)
        gate_logits = gate_logits + jnp.einsum(
            'bsu,eu->bse', qkv.astype(bf16), wg[:, j, :],
            preferred_element_type=jnp.float32)
    gate = _softmax_last(gate_logits + bg)                         # (B,tq,E)

    mixed = jnp.zeros((B, q_tile, U), jnp.float32)
    for j in range(E):
        mixed = mixed + expert_outs[j] * gate[:, :, j:j + 1]

    # residual quirk: the i-th *batch row* of split_x, broadcast over the batch
    res = split_ref[i, pl.ds(qs, q_tile), :]                       # (tq,U)
    y = _layernorm(mixed + res[None, :, :], lnw_ref[...], lnb_ref[...])

    # ---- fused per-head FFN branch: fc -> relu -> fc2 -> LayerNorm ---------
    pad2 = y == 0.0
    h = jnp.einsum('bsu,vu->bsv', y.astype(bf16), fcw_ref[...],
                   preferred_element_type=jnp.float32) + fcb_ref[...]
    h = jnp.where(pad2, 0.0, h)
    h = jnp.maximum(h, 0.0)
    h = jnp.einsum('bsu,vu->bsv', h.astype(bf16), fc2w_ref[...],
                   preferred_element_type=jnp.float32) + fc2b_ref[...]
    h = jnp.where(pad2, 0.0, h)
    out_ref[0] = _layernorm(h + y, flnw_ref[...], flnb_ref[...])


# ---------------------------------------------------------------------------
# Kernel 2: cross-head gating; does the head->lane transpose inside VMEM.
# ---------------------------------------------------------------------------
def gate_kernel(chunks_ref, gw_ref, out_ref, *, n_head):
    chunks = chunks_ref[...]                                       # (H,B,ts,U) f32
    gw = gw_ref[...]                                               # (H,H,U)    bf16
    gl = None
    for h in range(n_head):
        t = jnp.einsum('bsu,nu->bsn', chunks[h].astype(jnp.bfloat16), gw[:, h, :],
                       preferred_element_type=jnp.float32)
        gl = t if gl is None else gl + t
    gate = _softmax_last(gl)                                       # (B,ts,H)
    out_ref[...] = jnp.concatenate(
        [chunks[h] * gate[:, :, h:h + 1] for h in range(n_head)], axis=-1)


# ---------------------------------------------------------------------------
# Wrapper
# ---------------------------------------------------------------------------
def moe_multihead_forward(x, p, *, n_head, n_expert, head_unit):
    B, S, hidden = x.shape
    U = head_unit
    E = n_expert
    f32, bf16 = jnp.float32, jnp.bfloat16

    q_tile = 128 if (S % 128 == 0) else S      # q-tiling for realistic S; full S when small
    n_qt = S // q_tile

    # host-side weight fusion / re-layout + bf16 cast of MXU operands
    wq_flat = p['wq'].reshape(n_head, E * U, U)                    # (H, E*U, U)
    w_qkv = jnp.concatenate([p['wk'], p['wv'], wq_flat], axis=1).astype(bf16)
    wh = p['wh'].astype(bf16)                                      # (H, U, hidden)
    wg_r = p['wg'].reshape(n_head, E, E, U).astype(bf16)           # (H, E, E, U)
    fcw = p['ffn_fcw'].astype(bf16)
    fc2w = p['ffn_fc2w'].astype(bf16)
    gw_r = p['ffn_gw'].reshape(n_head, n_head, U).astype(bf16)     # (H_out, H, U)

    head_grid = pltpu.PrefetchScalarGridSpec(
        num_scalar_prefetch=0,
        grid=(n_head, n_qt),
        in_specs=[
            pl.BlockSpec((B, S, hidden), lambda i, qi: (0, 0, 0)),        # x (constant idx)
            pl.BlockSpec((1, U, hidden), lambda i, qi: (i, 0, 0)),        # head_layer W
            pl.BlockSpec((1, 1, U), lambda i, qi: (i, 0, 0)),             # head_layer b
            pl.BlockSpec((1, (2 + E) * U, U), lambda i, qi: (i, 0, 0)),   # fused K|V|Q W
            pl.BlockSpec((1, E, E, U), lambda i, qi: (i, 0, 0, 0)),       # gate W
            pl.BlockSpec((1, 1, E), lambda i, qi: (i, 0, 0)),             # gate b
            pl.BlockSpec((1, U), lambda i, qi: (0, 0)),                   # attn LN w
            pl.BlockSpec((1, U), lambda i, qi: (0, 0)),                   # attn LN b
            pl.BlockSpec((U, U), lambda i, qi: (0, 0)),                   # FFN fc W
            pl.BlockSpec((1, U), lambda i, qi: (0, 0)),                   # FFN fc b
            pl.BlockSpec((U, U), lambda i, qi: (0, 0)),                   # FFN fc2 W
            pl.BlockSpec((1, U), lambda i, qi: (0, 0)),                   # FFN fc2 b
            pl.BlockSpec((1, U), lambda i, qi: (0, 0)),                   # FFN LN w
            pl.BlockSpec((1, U), lambda i, qi: (0, 0)),                   # FFN LN b
        ],
        out_specs=pl.BlockSpec((1, B, q_tile, U), lambda i, qi: (i, 0, qi, 0)),
        scratch_shapes=[
            pltpu.VMEM((B, S, U), f32),         # split_x (f32: pad mask + residual)
            pltpu.VMEM((B, S, U), bf16),        # K
            pltpu.VMEM((B, S, U), bf16),        # V
            pltpu.VMEM((B, S, E * U), bf16),    # Q for all experts
        ],
    )

    chunks = pl.pallas_call(
        functools.partial(moe_head_ffn_kernel, n_expert=E, head_unit=U, q_tile=q_tile),
        out_shape=jax.ShapeDtypeStruct((n_head, B, S, U), f32),
        grid_spec=head_grid,
        compiler_params=pltpu.CompilerParams(
            # head axis parallel (megacore); q axis carries the K/V/Q scratch -> arbitrary
            dimension_semantics=("parallel", "arbitrary"),
            vmem_limit_bytes=48 * 1024 * 1024,
        ),
    )(x, wh, p['bh'], w_qkv, wg_r, p['bg'], p['lnw'], p['lnb'],
      fcw, p['ffn_fcb'], fc2w, p['ffn_fc2b'], p['ffn_lnw'], p['ffn_lnb'])

    # cross-head gating (tiny), tiled over sequence rows; lane-dense (hidden) output
    s_tile = 128 if (S % 128 == 0) else S
    gate_grid = pltpu.PrefetchScalarGridSpec(
        num_scalar_prefetch=0,
        grid=(S // s_tile,),
        in_specs=[
            pl.BlockSpec((n_head, B, s_tile, U), lambda si: (0, 0, si, 0)),
            pl.BlockSpec((n_head, n_head, U), lambda si: (0, 0, 0)),
        ],
        out_specs=pl.BlockSpec((B, s_tile, hidden), lambda si: (0, si, 0)),
    )
    out = pl.pallas_call(
        functools.partial(gate_kernel, n_head=n_head),
        out_shape=jax.ShapeDtypeStruct((B, S, hidden), f32),
        grid_spec=gate_grid,
        compiler_params=pltpu.CompilerParams(
            dimension_semantics=("parallel",),
            vmem_limit_bytes=48 * 1024 * 1024,
        ),
    )(chunks, gw_r)
    return out


# ---------------------------------------------------------------------------
# Deterministic parameter init (shapes from the module's __init__)
# ---------------------------------------------------------------------------
def init_params(key, *, hidden, n_head, n_expert):
    U = hidden // n_head
    ks = jax.random.split(key, 12)

    def unif(k, shape, fan_in):
        bound = 1.0 / (fan_in ** 0.5)
        return jax.random.uniform(k, shape, jnp.float32, -bound, bound)

    wh = unif(ks[0], (n_head, U, hidden), hidden)             # head_layer weights
    bh = unif(ks[1], (n_head, 1, U), hidden)                  # head_layer biases
    # w_q is a flat list of E*H matrices; head i / expert j uses index i*H + j
    wq_flat = unif(ks[2], (n_expert * n_head, U, U), U)
    idx = jnp.arange(n_head)[:, None] * n_head + jnp.arange(n_expert)[None, :]
    wq = wq_flat[idx]                                         # (H, E, U, U)
    wk = unif(ks[3], (n_head, U, U), U)
    wv = unif(ks[4], (n_head, U, U), U)
    wg = unif(ks[5], (n_head, n_expert, n_expert * U), n_expert * U)
    bg = unif(ks[6], (n_head, 1, n_expert), n_expert * U)
    lnw = jnp.ones((1, U), jnp.float32)
    lnb = jnp.zeros((1, U), jnp.float32)

    # FFN built inside forward(): fc / fc2 / norm / gate shared across heads
    ffn_fcw = unif(ks[7], (U, U), U)
    ffn_fcb = unif(ks[8], (1, U), U)
    ffn_fc2w = unif(ks[9], (U, U), U)
    ffn_fc2b = unif(ks[10], (1, U), U)
    ffn_lnw = jnp.ones((1, U), jnp.float32)
    ffn_lnb = jnp.zeros((1, U), jnp.float32)
    ffn_gw = unif(ks[11], (n_head, hidden), hidden)           # Linear(hidden -> H), no bias

    return dict(wh=wh, bh=bh, wq=wq, wk=wk, wv=wv, wg=wg, bg=bg,
                lnw=lnw, lnb=lnb,
                ffn_fcw=ffn_fcw, ffn_fcb=ffn_fcb, ffn_fc2w=ffn_fc2w,
                ffn_fc2b=ffn_fc2b, ffn_lnw=ffn_lnw, ffn_lnb=ffn_lnb,
                ffn_gw=ffn_gw)


# ---------------------------------------------------------------------------
# Pure-JAX f32 reference (mirrors the PyTorch semantics) for validation
# ---------------------------------------------------------------------------
def reference_forward(x, p, *, n_head, n_expert, head_unit):
    B, S, hidden = x.shape
    U = head_unit
    mask = jnp.where(jnp.triu(jnp.ones((S, S), jnp.bool_), k=1),
                     -jnp.inf, 0.0).astype(jnp.float32)
    f_n = []
    for i in range(n_head):
        split_x = x @ p['wh'][i].T + p['bh'][i]
        pad = split_x == 0.0
        k = split_x @ p['wk'][i].T
        v = split_x @ p['wv'][i].T
        outs = []
        for j in range(n_expert):
            q = split_x @ p['wq'][i, j].T
            qk = jnp.einsum('bqu,bku->bqk', q, k) * (U ** 0.5) + mask
            qkv = jnp.einsum('bqk,bku->bqu', jax.nn.softmax(qk, axis=-1), v)
            outs.append(jnp.where(pad, 0.0, qkv))
        cat = jnp.concatenate(outs, -1)
        g = jax.nn.softmax(cat @ p['wg'][i].T + p['bg'][i], axis=-1)
        mixed = (cat.reshape(B, S, n_expert, U) * g[..., None]).sum(axis=2)
        y = mixed + split_x[i]
        f_n.append(_layernorm(y, p['lnw'], p['lnb']))
    f_n = jnp.concatenate(f_n, -1)

    chunks = []
    for i in range(n_head):
        cx = f_n[:, :, i * U:(i + 1) * U]
        pad = cx == 0.0
        h = jnp.where(pad, 0.0, cx @ p['ffn_fcw'].T + p['ffn_fcb'])
        h = jnp.maximum(h, 0.0)
        h = jnp.where(pad, 0.0, h @ p['ffn_fc2w'].T + p['ffn_fc2b'])
        chunks.append(_layernorm(h + cx, p['ffn_lnw'], p['ffn_lnb']))
    cat = jnp.concatenate(chunks, -1)
    g = jax.nn.softmax(cat @ p['ffn_gw'].T, axis=-1)
    out = cat.reshape(B, S, n_head, U) * g[..., None]
    return out.reshape(B, S, hidden)


if __name__ == "__main__":
    B, S, H, E = 2, 16, 2, 2       # batch, seq(=maxlen), n_head, n_expert
    hidden = 32
    U = hidden // H

    key = jax.random.PRNGKey(0)
    kx, kp = jax.random.split(key)
    x = jax.random.normal(kx, (B, S, hidden), jnp.float32)
    params = init_params(kp, hidden=hidden, n_head=H, n_expert=E)

    out = moe_multihead_forward(x, params, n_head=H, n_expert=E, head_unit=U)
    out = jax.block_until_ready(out)

    ref = reference_forward(x, params, n_head=H, n_expert=E, head_unit=U)
    assert out.shape == (B, S, hidden)
    err = float(jnp.max(jnp.abs(out - ref)))
    # bf16 MXU operands + approx reciprocal => relaxed tolerance vs the f32 reference
    if not bool(jnp.allclose(out, ref, atol=5e-2, rtol=5e-2)):
        raise AssertionError(f"Pallas output does not match JAX reference (max err {err})")
    print("KERNEL_OK")
</pallas_src>

<mosaic_0001>
module attributes {stable_mosaic.version = 11 : i64} {
  func.func @moe_head_ffn_kernel(%arg0: i32, %arg1: i32, %arg2: memref<2x16x32xf32, #tpu.memory_space<vmem>>, %arg3: memref<1x16x32xbf16, #tpu.memory_space<vmem>>, %arg4: memref<1x1x16xf32, #tpu.memory_space<vmem>>, %arg5: memref<1x64x16xbf16, #tpu.memory_space<vmem>>, %arg6: memref<1x2x2x16xbf16, #tpu.memory_space<vmem>>, %arg7: memref<1x1x2xf32, #tpu.memory_space<vmem>>, %arg8: memref<1x16xf32, #tpu.memory_space<vmem>>, %arg9: memref<1x16xf32, #tpu.memory_space<vmem>>, %arg10: memref<16x16xbf16, #tpu.memory_space<vmem>>, %arg11: memref<1x16xf32, #tpu.memory_space<vmem>>, %arg12: memref<16x16xbf16, #tpu.memory_space<vmem>>, %arg13: memref<1x16xf32, #tpu.memory_space<vmem>>, %arg14: memref<1x16xf32, #tpu.memory_space<vmem>>, %arg15: memref<1x16xf32, #tpu.memory_space<vmem>>, %arg16: memref<1x2x16x16xf32, #tpu.memory_space<vmem>>, %arg17: memref<2x16x16xf32, #tpu.memory_space<vmem>>, %arg18: memref<2x16x16xbf16, #tpu.memory_space<vmem>>, %arg19: memref<2x16x16xbf16, #tpu.memory_space<vmem>>, %arg20: memref<2x16x32xbf16, #tpu.memory_space<vmem>>) attributes {dimension_semantics = [#tpu.dimension_semantics<parallel>, #tpu.dimension_semantics<arbitrary>], iteration_bounds = array<i64: 2, 1>, scalar_prefetch = 0 : i64, scratch_operands = 4 : i64, tpu.core_type = #tpu.core_type<tc>, window_params = [{pipeline_mode = #tpu.pipeline_mode<synchronous>, transform_indices = @transform_0, window_bounds = array<i64: 2, 16, 32>}, {transform_indices = @transform_1, window_bounds = array<i64: 1, 16, 32>}, {transform_indices = @transform_2, window_bounds = array<i64: 1, 1, 16>}, {transform_indices = @transform_3, window_bounds = array<i64: 1, 64, 16>}, {transform_indices = @transform_4, window_bounds = array<i64: 1, 2, 2, 16>}, {transform_indices = @transform_5, window_bounds = array<i64: 1, 1, 2>}, {pipeline_mode = #tpu.pipeline_mode<synchronous>, transform_indices = @transform_6, window_bounds = array<i64: 1, 16>}, {pipeline_mode = #tpu.pipeline_mode<synchronous>, transform_indices = @transform_7, window_bounds = array<i64: 1, 16>}, {pipeline_mode = #tpu.pipeline_mode<synchronous>, transform_indices = @transform_8, window_bounds = array<i64: 16, 16>}, {pipeline_mode = #tpu.pipeline_mode<synchronous>, transform_indices = @transform_9, window_bounds = array<i64: 1, 16>}, {pipeline_mode = #tpu.pipeline_mode<synchronous>, transform_indices = @transform_10, window_bounds = array<i64: 16, 16>}, {pipeline_mode = #tpu.pipeline_mode<synchronous>, transform_indices = @transform_11, window_bounds = array<i64: 1, 16>}, {pipeline_mode = #tpu.pipeline_mode<synchronous>, transform_indices = @transform_12, window_bounds = array<i64: 1, 16>}, {pipeline_mode = #tpu.pipeline_mode<synchronous>, transform_indices = @transform_13, window_bounds = array<i64: 1, 16>}, {transform_indices = @transform_14, window_bounds = array<i64: 1, 2, 16, 16>}]} {
    %c16_i32 = arith.constant 16 : i32
    %0 = arith.muli %arg1, %c16_i32 : i32
    %1 = tpu.assume_multiple %0, 16 : i32
    %c0_i32 = arith.constant 0 : i32
    %2 = arith.cmpi eq, %arg1, %c0_i32 : i32
    %3 = arith.extui %2 : i1 to i32
    %c0_i32_0 = arith.constant 0 : i32
    %4 = arith.cmpi ne, %3, %c0_i32_0 : i32
    scf.if %4 {
      %c0_74 = arith.constant 0 : index
      %c0_75 = arith.constant 0 : index
      %c0_76 = arith.constant 0 : index
      %185 = vector.load %arg2[%c0_74, %c0_75, %c0_76] : memref<2x16x32xf32, #tpu.memory_space<vmem>>, vector<2x16x32xf32>
      %186 = arith.truncf %185 : vector<2x16x32xf32> to vector<2x16x32xbf16>
      %c0_77 = arith.constant 0 : index
      %c0_78 = arith.constant 0 : index
      %c0_79 = arith.constant 0 : index
      %187 = vector.load %arg3[%c0_77, %c0_78, %c0_79] : memref<1x16x32xbf16, #tpu.memory_space<vmem>>, vector<1x16x32xbf16>
      %188 = vector.shape_cast %187 : vector<1x16x32xbf16> to vector<16x32xbf16>
      "tpu.trace_start"() <{level = 10 : i32, message = "bsh,uh->bsu"}> : () -> ()
      %cst_80 = arith.constant dense<0.000000e+00> : vector<2x16x16xf32>
      %189 = tpu.matmul %186, %188, %cst_80 {dimension_numbers = #tpu.dot_dimension_numbers<[2], [1], [0, 1], [0], [0, 0, 0, 1, 1, 0], [], []>} : vector<2x16x32xbf16>, vector<16x32xbf16>, vector<2x16x16xf32> -> vector<2x16x16xf32>
      "tpu.trace_stop"() : () -> ()
      %c0_81 = arith.constant 0 : index
      %c0_82 = arith.constant 0 : index
      %c0_83 = arith.constant 0 : index
      %190 = vector.load %arg4[%c0_81, %c0_82, %c0_83] : memref<1x1x16xf32, #tpu.memory_space<vmem>>, vector<1x1x16xf32>
      %191 = vector.shape_cast %190 : vector<1x1x16xf32> to vector<1x16xf32>
      %192 = vector.shape_cast %191 : vector<1x16xf32> to vector<1x1x16xf32>
      %193 = vector.broadcast %192 : vector<1x1x16xf32> to vector<2x16x16xf32>
      %194 = arith.addf %189, %193 : vector<2x16x16xf32>
      %c0_84 = arith.constant 0 : index
      %c0_85 = arith.constant 0 : index
      %c0_86 = arith.constant 0 : index
      %195 = vector.load %arg17[%c0_84, %c0_85, %c0_86] : memref<2x16x16xf32, #tpu.memory_space<vmem>>, vector<2x16x16xf32>
      tpu.vector_store %arg17[%c0_84, %c0_85, %c0_86], %194 {strides = array<i32>} : memref<2x16x16xf32, #tpu.memory_space<vmem>>, vector<2x16x16xf32>,
      %196 = arith.truncf %194 : vector<2x16x16xf32> to vector<2x16x16xbf16>
      %c0_87 = arith.constant 0 : index
      %c0_88 = arith.constant 0 : index
      %c0_89 = arith.constant 0 : index
      %197 = vector.load %arg5[%c0_87, %c0_88, %c0_89] : memref<1x64x16xbf16, #tpu.memory_space<vmem>>, vector<1x64x16xbf16>
      %198 = vector.shape_cast %197 : vector<1x64x16xbf16> to vector<64x16xbf16>
      "tpu.trace_start"() <{level = 10 : i32, message = "bsu,vu->bsv"}> : () -> ()
      %cst_90 = arith.constant dense<0.000000e+00> : vector<2x16x64xf32>
      %199 = tpu.matmul %196, %198, %cst_90 {dimension_numbers = #tpu.dot_dimension_numbers<[2], [1], [0, 1], [0], [0, 0, 0, 1, 1, 0], [], []>} : vector<2x16x16xbf16>, vector<64x16xbf16>, vector<2x16x64xf32> -> vector<2x16x64xf32>
      "tpu.trace_stop"() : () -> ()
      %200 = vector.extract_strided_slice %199 {offsets = [0, 0, 0], sizes = [2, 16, 16], strides = [1, 1, 1]} : vector<2x16x64xf32> to vector<2x16x16xf32>
      %201 = arith.truncf %200 : vector<2x16x16xf32> to vector<2x16x16xbf16>
      %c0_91 = arith.constant 0 : index
      %c0_92 = arith.constant 0 : index
      %c0_93 = arith.constant 0 : index
      %202 = vector.load %arg18[%c0_91, %c0_92, %c0_93] : memref<2x16x16xbf16, #tpu.memory_space<vmem>>, vector<2x16x16xbf16>
      tpu.vector_store %arg18[%c0_91, %c0_92, %c0_93], %201 {strides = array<i32>} : memref<2x16x16xbf16, #tpu.memory_space<vmem>>, vector<2x16x16xbf16>,
      %203 = vector.extract_strided_slice %199 {offsets = [0, 0, 16], sizes = [2, 16, 16], strides = [1, 1, 1]} : vector<2x16x64xf32> to vector<2x16x16xf32>
      %204 = arith.truncf %203 : vector<2x16x16xf32> to vector<2x16x16xbf16>
      %c0_94 = arith.constant 0 : index
      %c0_95 = arith.constant 0 : index
      %c0_96 = arith.constant 0 : index
      %205 = vector.load %arg19[%c0_94, %c0_95, %c0_96] : memref<2x16x16xbf16, #tpu.memory_space<vmem>>, vector<2x16x16xbf16>
      tpu.vector_store %arg19[%c0_94, %c0_95, %c0_96], %204 {strides = array<i32>} : memref<2x16x16xbf16, #tpu.memory_space<vmem>>, vector<2x16x16xbf16>,
      %206 = vector.extract_strided_slice %199 {offsets = [0, 0, 32], sizes = [2, 16, 32], strides = [1, 1, 1]} : vector<2x16x64xf32> to vector<2x16x32xf32>
      %207 = arith.truncf %206 : vector<2x16x32xf32> to vector<2x16x32xbf16>
      %c0_97 = arith.constant 0 : index
      %c0_98 = arith.constant 0 : index
      %c0_99 = arith.constant 0 : index
      %208 = vector.load %arg20[%c0_97, %c0_98, %c0_99] : memref<2x16x32xbf16, #tpu.memory_space<vmem>>, vector<2x16x32xbf16>
      tpu.vector_store %arg20[%c0_97, %c0_98, %c0_99], %207 {strides = array<i32>} : memref<2x16x32xbf16, #tpu.memory_space<vmem>>, vector<2x16x32xbf16>,
    } else {
    }
    %c0 = arith.constant 0 : index
    %5 = arith.index_cast %1 : i32 to index
    %c0_1 = arith.constant 0 : index
    %6 = vector.load %arg17[%c0, %5, %c0_1] : memref<2x16x16xf32, #tpu.memory_space<vmem>>, vector<2x16x16xf32>
    %cst = arith.constant 0.000000e+00 : f32
    %7 = vector.broadcast %cst : f32 to vector<2x16x16xf32>
    %8 = arith.cmpf oeq, %6, %7 : vector<2x16x16xf32>
    %c0_2 = arith.constant 0 : index
    %c0_3 = arith.constant 0 : index
    %c0_4 = arith.constant 0 : index
    %9 = vector.load %arg18[%c0_2, %c0_3, %c0_4] : memref<2x16x16xbf16, #tpu.memory_space<vmem>>, vector<2x16x16xbf16>
    %c0_5 = arith.constant 0 : index
    %c0_6 = arith.constant 0 : index
    %c0_7 = arith.constant 0 : index
    %10 = vector.load %arg19[%c0_5, %c0_6, %c0_7] : memref<2x16x16xbf16, #tpu.memory_space<vmem>>, vector<2x16x16xbf16>
    %c0_8 = arith.constant 0 : index
    %11 = arith.index_cast %1 : i32 to index
    %c0_9 = arith.constant 0 : index
    %12 = vector.load %arg20[%c0_8, %11, %c0_9] : memref<2x16x32xbf16, #tpu.memory_space<vmem>>, vector<2x16x32xbf16>
    %13 = tpu.iota {dimensions = array<i32: 0>} : vector<16x16xi32>
    %14 = vector.broadcast %1 : i32 to vector<16x16xi32>
    %15 = arith.addi %13, %14 : vector<16x16xi32>
    %16 = tpu.iota {dimensions = array<i32: 1>} : vector<16x16xi32>
    %17 = arith.cmpi sgt, %16, %15 : vector<16x16xi32>
    %cst_10 = arith.constant 0xFF800000 : f32
    %cst_11 = arith.constant 0.000000e+00 : f32
    %18 = vector.broadcast %cst_10 : f32 to vector<16x16xf32>
    %19 = vector.broadcast %cst_11 : f32 to vector<16x16xf32>
    %20 = arith.select %17, %18, %19 : vector<16x16xi1>, vector<16x16xf32>
    %c0_12 = arith.constant 0 : index
    %c0_13 = arith.constant 0 : index
    %c0_14 = arith.constant 0 : index
    %c0_15 = arith.constant 0 : index
    %21 = vector.load %arg6[%c0_12, %c0_13, %c0_14, %c0_15] : memref<1x2x2x16xbf16, #tpu.memory_space<vmem>>, vector<1x2x2x16xbf16>
    %22 = vector.shape_cast %21 : vector<1x2x2x16xbf16> to vector<2x2x16xbf16>
    %c0_16 = arith.constant 0 : index
    %c0_17 = arith.constant 0 : index
    %c0_18 = arith.constant 0 : index
    %23 = vector.load %arg7[%c0_16, %c0_17, %c0_18] : memref<1x1x2xf32, #tpu.memory_space<vmem>>, vector<1x1x2xf32>
    %24 = vector.shape_cast %23 : vector<1x1x2xf32> to vector<1x2xf32>
    %cst_19 = arith.constant 0.000000e+00 : f32
    %25 = vector.broadcast %cst_19 : f32 to vector<2x16x2xf32>
    %26 = vector.extract_strided_slice %12 {offsets = [0, 0, 0], sizes = [2, 16, 16], strides = [1, 1, 1]} : vector<2x16x32xbf16> to vector<2x16x16xbf16>
    "tpu.trace_start"() <{level = 10 : i32, message = "bqu,bku->bqk"}> : () -> ()
    %cst_20 = arith.constant dense<0.000000e+00> : vector<2x16x16xf32>
    %27 = tpu.matmul %26, %9, %cst_20 {dimension_numbers = #tpu.dot_dimension_numbers<[2], [2], [1], [1], [0, 0, 0, 1, 1, 1], [0], [0]>} : vector<2x16x16xbf16>, vector<2x16x16xbf16>, vector<2x16x16xf32> -> vector<2x16x16xf32>
    "tpu.trace_stop"() : () -> ()
    %cst_21 = arith.constant 4.000000e+00 : f32
    %28 = vector.broadcast %cst_21 : f32 to vector<2x16x16xf32>
    %29 = arith.mulf %27, %28 : vector<2x16x16xf32>
    %30 = vector.shape_cast %20 : vector<16x16xf32> to vector<1x16x16xf32>
    %31 = vector.broadcast %30 : vector<1x16x16xf32> to vector<2x16x16xf32>
    %32 = arith.addf %29, %31 : vector<2x16x16xf32>
    %cst_22 = arith.constant dense<0xFF800000> : vector<2x16xf32>
    %33 = vector.multi_reduction <maximumf>, %32, %cst_22 [2] : vector<2x16x16xf32> to vector<2x16xf32>
    %34 = vector.shape_cast %33 : vector<2x16xf32> to vector<2x16x1xf32>
    %35 = vector.broadcast %34 : vector<2x16x1xf32> to vector<2x16x16xf32>
    %36 = arith.subf %32, %35 : vector<2x16x16xf32>
    %37 = math.exp %36 : vector<2x16x16xf32>
    %cst_23 = arith.constant dense<0.000000e+00> : vector<2x16xf32>
    %38 = vector.multi_reduction <add>, %37, %cst_23 [2] : vector<2x16x16xf32> to vector<2x16xf32>
    %39 = vector.shape_cast %38 : vector<2x16xf32> to vector<2x16x1xf32>
    %40 = tpu.reciprocal %39 {approx = true} : vector<2x16x1xf32> -> vector<2x16x1xf32>
    %41 = vector.broadcast %40 : vector<2x16x1xf32> to vector<2x16x16xf32>
    %42 = arith.mulf %37, %41 : vector<2x16x16xf32>
    %43 = arith.truncf %42 : vector<2x16x16xf32> to vector<2x16x16xbf16>
    "tpu.trace_start"() <{level = 10 : i32, message = "bqk,bku->bqu"}> : () -> ()
    %cst_24 = arith.constant dense<0.000000e+00> : vector<2x16x16xf32>
    %44 = tpu.matmul %43, %10, %cst_24 {dimension_numbers = #tpu.dot_dimension_numbers<[2], [1], [1], [2], [0, 0, 0, 1, 1, 2], [0], [0]>} : vector<2x16x16xbf16>, vector<2x16x16xbf16>, vector<2x16x16xf32> -> vector<2x16x16xf32>
    %cst_25 = arith.constant 0.000000e+00 : f32
    "tpu.trace_stop"() : () -> ()
    %45 = vector.broadcast %cst_25 : f32 to vector<2x16x16xf32>
    %46 = arith.select %8, %45, %44 : vector<2x16x16xi1>, vector<2x16x16xf32>
    %47 = arith.truncf %46 : vector<2x16x16xf32> to vector<2x16x16xbf16>
    %48 = vector.extract_strided_slice %22 {offsets = [0, 0, 0], sizes = [2, 1, 16], strides = [1, 1, 1]} : vector<2x2x16xbf16> to vector<2x1x16xbf16>
    %49 = vector.shape_cast %48 : vector<2x1x16xbf16> to vector<2x16xbf16>
    "tpu.trace_start"() <{level = 10 : i32, message = "bsu,eu->bse"}> : () -> ()
    %cst_26 = arith.constant dense<0.000000e+00> : vector<2x16x2xf32>
    %50 = tpu.matmul %47, %49, %cst_26 {dimension_numbers = #tpu.dot_dimension_numbers<[2], [1], [0, 1], [0], [0, 0, 0, 1, 1, 0], [], []>} : vector<2x16x16xbf16>, vector<2x16xbf16>, vector<2x16x2xf32> -> vector<2x16x2xf32>
    "tpu.trace_stop"() : () -> ()
    %51 = arith.addf %25, %50 : vector<2x16x2xf32>
    %52 = vector.extract_strided_slice %12 {offsets = [0, 0, 16], sizes = [2, 16, 16], strides = [1, 1, 1]} : vector<2x16x32xbf16> to vector<2x16x16xbf16>
    "tpu.trace_start"() <{level = 10 : i32, message = "bqu,bku->bqk"}> : () -> ()
    %cst_27 = arith.constant dense<0.000000e+00> : vector<2x16x16xf32>
    %53 = tpu.matmul %52, %9, %cst_27 {dimension_numbers = #tpu.dot_dimension_numbers<[2], [2], [1], [1], [0, 0, 0, 1, 1, 1], [0], [0]>} : vector<2x16x16xbf16>, vector<2x16x16xbf16>, vector<2x16x16xf32> -> vector<2x16x16xf32>
    "tpu.trace_stop"() : () -> ()
    %cst_28 = arith.constant 4.000000e+00 : f32
    %54 = vector.broadcast %cst_28 : f32 to vector<2x16x16xf32>
    %55 = arith.mulf %53, %54 : vector<2x16x16xf32>
    %56 = vector.shape_cast %20 : vector<16x16xf32> to vector<1x16x16xf32>
    %57 = vector.broadcast %56 : vector<1x16x16xf32> to vector<2x16x16xf32>
    %58 = arith.addf %55, %57 : vector<2x16x16xf32>
    %cst_29 = arith.constant dense<0xFF800000> : vector<2x16xf32>
    %59 = vector.multi_reduction <maximumf>, %58, %cst_29 [2] : vector<2x16x16xf32> to vector<2x16xf32>
    %60 = vector.shape_cast %59 : vector<2x16xf32> to vector<2x16x1xf32>
    %61 = vector.broadcast %60 : vector<2x16x1xf32> to vector<2x16x16xf32>
    %62 = arith.subf %58, %61 : vector<2x16x16xf32>
    %63 = math.exp %62 : vector<2x16x16xf32>
    %cst_30 = arith.constant dense<0.000000e+00> : vector<2x16xf32>
    %64 = vector.multi_reduction <add>, %63, %cst_30 [2] : vector<2x16x16xf32> to vector<2x16xf32>
    %65 = vector.shape_cast %64 : vector<2x16xf32> to vector<2x16x1xf32>
    %66 = tpu.reciprocal %65 {approx = true} : vector<2x16x1xf32> -> vector<2x16x1xf32>
    %67 = vector.broadcast %66 : vector<2x16x1xf32> to vector<2x16x16xf32>
    %68 = arith.mulf %63, %67 : vector<2x16x16xf32>
    %69 = arith.truncf %68 : vector<2x16x16xf32> to vector<2x16x16xbf16>
    "tpu.trace_start"() <{level = 10 : i32, message = "bqk,bku->bqu"}> : () -> ()
    %cst_31 = arith.constant dense<0.000000e+00> : vector<2x16x16xf32>
    %70 = tpu.matmul %69, %10, %cst_31 {dimension_numbers = #tpu.dot_dimension_numbers<[2], [1], [1], [2], [0, 0, 0, 1, 1, 2], [0], [0]>} : vector<2x16x16xbf16>, vector<2x16x16xbf16>, vector<2x16x16xf32> -> vector<2x16x16xf32>
    %cst_32 = arith.constant 0.000000e+00 : f32
    "tpu.trace_stop"() : () -> ()
    %71 = vector.broadcast %cst_32 : f32 to vector<2x16x16xf32>
    %72 = arith.select %8, %71, %70 : vector<2x16x16xi1>, vector<2x16x16xf32>
    %73 = arith.truncf %72 : vector<2x16x16xf32> to vector<2x16x16xbf16>
    %74 = vector.extract_strided_slice %22 {offsets = [0, 1, 0], sizes = [2, 1, 16], strides = [1, 1, 1]} : vector<2x2x16xbf16> to vector<2x1x16xbf16>
    %75 = vector.shape_cast %74 : vector<2x1x16xbf16> to vector<2x16xbf16>
    "tpu.trace_start"() <{level = 10 : i32, message = "bsu,eu->bse"}> : () -> ()
    %cst_33 = arith.constant dense<0.000000e+00> : vector<2x16x2xf32>
    %76 = tpu.matmul %73, %75, %cst_33 {dimension_numbers = #tpu.dot_dimension_numbers<[2], [1], [0, 1], [0], [0, 0, 0, 1, 1, 0], [], []>} : vector<2x16x16xbf16>, vector<2x16xbf16>, vector<2x16x2xf32> -> vector<2x16x2xf32>
    "tpu.trace_stop"() : () -> ()
    %77 = arith.addf %51, %76 : vector<2x16x2xf32>
    %78 = vector.shape_cast %24 : vector<1x2xf32> to vector<1x1x2xf32>
    %79 = vector.broadcast %78 : vector<1x1x2xf32> to vector<2x16x2xf32>
    %80 = arith.addf %77, %79 : vector<2x16x2xf32>
    %cst_34 = arith.constant dense<0xFF800000> : vector<2x16xf32>
    %81 = vector.multi_reduction <maximumf>, %80, %cst_34 [2] : vector<2x16x2xf32> to vector<2x16xf32>
    %82 = vector.shape_cast %81 : vector<2x16xf32> to vector<2x16x1xf32>
    %83 = vector.broadcast %82 : vector<2x16x1xf32> to vector<2x16x2xf32>
    %84 = arith.subf %80, %83 : vector<2x16x2xf32>
    %85 = math.exp %84 : vector<2x16x2xf32>
    %cst_35 = arith.constant dense<0.000000e+00> : vector<2x16xf32>
    %86 = vector.multi_reduction <add>, %85, %cst_35 [2] : vector<2x16x2xf32> to vector<2x16xf32>
    %87 = vector.shape_cast %86 : vector<2x16xf32> to vector<2x16x1xf32>
    %88 = tpu.reciprocal %87 {approx = true} : vector<2x16x1xf32> -> vector<2x16x1xf32>
    %89 = vector.broadcast %88 : vector<2x16x1xf32> to vector<2x16x2xf32>
    %90 = arith.mulf %85, %89 : vector<2x16x2xf32>
    %cst_36 = arith.constant 0.000000e+00 : f32
    %91 = vector.broadcast %cst_36 : f32 to vector<2x16x16xf32>
    %92 = vector.extract_strided_slice %90 {offsets = [0, 0, 0], sizes = [2, 16, 1], strides = [1, 1, 1]} : vector<2x16x2xf32> to vector<2x16x1xf32>
    %93 = vector.broadcast %92 : vector<2x16x1xf32> to vector<2x16x16xf32>
    %94 = arith.mulf %46, %93 : vector<2x16x16xf32>
    %95 = arith.addf %91, %94 : vector<2x16x16xf32>
    %96 = vector.extract_strided_slice %90 {offsets = [0, 0, 1], sizes = [2, 16, 1], strides = [1, 1, 1]} : vector<2x16x2xf32> to vector<2x16x1xf32>
    %97 = vector.broadcast %96 : vector<2x16x1xf32> to vector<2x16x16xf32>
    %98 = arith.mulf %72, %97 : vector<2x16x16xf32>
    %99 = arith.addf %95, %98 : vector<2x16x16xf32>
    %100 = arith.index_cast %arg0 : i32 to index
    %101 = arith.index_cast %1 : i32 to index
    %c0_37 = arith.constant 0 : index
    %102 = vector.load %arg17[%100, %101, %c0_37] : memref<2x16x16xf32, #tpu.memory_space<vmem>>, vector<1x16x16xf32>
    %103 = vector.shape_cast %102 : vector<1x16x16xf32> to vector<16x16xf32>
    %104 = vector.shape_cast %103 : vector<16x16xf32> to vector<1x16x16xf32>
    %105 = vector.broadcast %104 : vector<1x16x16xf32> to vector<2x16x16xf32>
    %106 = arith.addf %99, %105 : vector<2x16x16xf32>
    %c0_38 = arith.constant 0 : index
    %c0_39 = arith.constant 0 : index
    %107 = vector.load %arg8[%c0_38, %c0_39] : memref<1x16xf32, #tpu.memory_space<vmem>>, vector<1x16xf32>
    %c0_40 = arith.constant 0 : index
    %c0_41 = arith.constant 0 : index
    %108 = vector.load %arg9[%c0_40, %c0_41] : memref<1x16xf32, #tpu.memory_space<vmem>>, vector<1x16xf32>
    %cst_42 = arith.constant dense<0.000000e+00> : vector<2x16xf32>
    %109 = vector.multi_reduction <add>, %106, %cst_42 [2] : vector<2x16x16xf32> to vector<2x16xf32>
    %110 = vector.shape_cast %109 : vector<2x16xf32> to vector<2x16x1xf32>
    %cst_43 = arith.constant 1.600000e+01 : f32
    %111 = vector.broadcast %cst_43 : f32 to vector<2x16x1xf32>
    %112 = arith.divf %110, %111 : vector<2x16x1xf32>
    %113 = vector.broadcast %112 : vector<2x16x1xf32> to vector<2x16x16xf32>
    %114 = arith.subf %106, %113 : vector<2x16x16xf32>
    %115 = arith.mulf %114, %114 : vector<2x16x16xf32>
    %cst_44 = arith.constant dense<0.000000e+00> : vector<2x16xf32>
    %116 = vector.multi_reduction <add>, %115, %cst_44 [2] : vector<2x16x16xf32> to vector<2x16xf32>
    %117 = vector.shape_cast %116 : vector<2x16xf32> to vector<2x16x1xf32>
    %cst_45 = arith.constant 1.600000e+01 : f32
    %118 = vector.broadcast %cst_45 : f32 to vector<2x16x1xf32>
    %119 = arith.divf %117, %118 : vector<2x16x1xf32>
    %120 = vector.broadcast %112 : vector<2x16x1xf32> to vector<2x16x16xf32>
    %121 = arith.subf %106, %120 : vector<2x16x16xf32>
    %cst_46 = arith.constant 9.99999993E-9 : f32
    %122 = vector.broadcast %cst_46 : f32 to vector<2x16x1xf32>
    %123 = arith.addf %119, %122 : vector<2x16x1xf32>
    %124 = math.rsqrt %123 : vector<2x16x1xf32>
    %125 = vector.broadcast %124 : vector<2x16x1xf32> to vector<2x16x16xf32>
    %126 = arith.mulf %121, %125 : vector<2x16x16xf32>
    %127 = vector.shape_cast %107 : vector<1x16xf32> to vector<1x1x16xf32>
    %128 = vector.broadcast %127 : vector<1x1x16xf32> to vector<2x16x16xf32>
    %129 = arith.mulf %126, %128 : vector<2x16x16xf32>
    %130 = vector.shape_cast %108 : vector<1x16xf32> to vector<1x1x16xf32>
    %131 = vector.broadcast %130 : vector<1x1x16xf32> to vector<2x16x16xf32>
    %132 = arith.addf %129, %131 : vector<2x16x16xf32>
    %cst_47 = arith.constant 0.000000e+00 : f32
    %133 = vector.broadcast %cst_47 : f32 to vector<2x16x16xf32>
    %134 = arith.cmpf oeq, %132, %133 : vector<2x16x16xf32>
    %135 = arith.truncf %132 : vector<2x16x16xf32> to vector<2x16x16xbf16>
    %c0_48 = arith.constant 0 : index
    %c0_49 = arith.constant 0 : index
    %136 = vector.load %arg10[%c0_48, %c0_49] : memref<16x16xbf16, #tpu.memory_space<vmem>>, vector<16x16xbf16>
    "tpu.trace_start"() <{level = 10 : i32, message = "bsu,vu->bsv"}> : () -> ()
    %cst_50 = arith.constant dense<0.000000e+00> : vector<2x16x16xf32>
    %137 = tpu.matmul %135, %136, %cst_50 {dimension_numbers = #tpu.dot_dimension_numbers<[2], [1], [0, 1], [0], [0, 0, 0, 1, 1, 0], [], []>} : vector<2x16x16xbf16>, vector<16x16xbf16>, vector<2x16x16xf32> -> vector<2x16x16xf32>
    "tpu.trace_stop"() : () -> ()
    %c0_51 = arith.constant 0 : index
    %c0_52 = arith.constant 0 : index
    %138 = vector.load %arg11[%c0_51, %c0_52] : memref<1x16xf32, #tpu.memory_space<vmem>>, vector<1x16xf32>
    %139 = vector.shape_cast %138 : vector<1x16xf32> to vector<1x1x16xf32>
    %140 = vector.broadcast %139 : vector<1x1x16xf32> to vector<2x16x16xf32>
    %141 = arith.addf %137, %140 : vector<2x16x16xf32>
    %cst_53 = arith.constant 0.000000e+00 : f32
    %142 = vector.broadcast %cst_53 : f32 to vector<2x16x16xf32>
    %143 = arith.select %134, %142, %141 : vector<2x16x16xi1>, vector<2x16x16xf32>
    %cst_54 = arith.constant 0.000000e+00 : f32
    %144 = vector.broadcast %cst_54 : f32 to vector<2x16x16xf32>
    %145 = arith.maximumf %143, %144 : vector<2x16x16xf32>
    %146 = arith.truncf %145 : vector<2x16x16xf32> to vector<2x16x16xbf16>
    %c0_55 = arith.constant 0 : index
    %c0_56 = arith.constant 0 : index
    %147 = vector.load %arg12[%c0_55, %c0_56] : memref<16x16xbf16, #tpu.memory_space<vmem>>, vector<16x16xbf16>
    "tpu.trace_start"() <{level = 10 : i32, message = "bsu,vu->bsv"}> : () -> ()
    %cst_57 = arith.constant dense<0.000000e+00> : vector<2x16x16xf32>
    %148 = tpu.matmul %146, %147, %cst_57 {dimension_numbers = #tpu.dot_dimension_numbers<[2], [1], [0, 1], [0], [0, 0, 0, 1, 1, 0], [], []>} : vector<2x16x16xbf16>, vector<16x16xbf16>, vector<2x16x16xf32> -> vector<2x16x16xf32>
    "tpu.trace_stop"() : () -> ()
    %c0_58 = arith.constant 0 : index
    %c0_59 = arith.constant 0 : index
    %149 = vector.load %arg13[%c0_58, %c0_59] : memref<1x16xf32, #tpu.memory_space<vmem>>, vector<1x16xf32>
    %150 = vector.shape_cast %149 : vector<1x16xf32> to vector<1x1x16xf32>
    %151 = vector.broadcast %150 : vector<1x1x16xf32> to vector<2x16x16xf32>
    %152 = arith.addf %148, %151 : vector<2x16x16xf32>
    %cst_60 = arith.constant 0.000000e+00 : f32
    %153 = vector.broadcast %cst_60 : f32 to vector<2x16x16xf32>
    %154 = arith.select %134, %153, %152 : vector<2x16x16xi1>, vector<2x16x16xf32>
    %155 = arith.addf %154, %132 : vector<2x16x16xf32>
    %c0_61 = arith.constant 0 : index
    %c0_62 = arith.constant 0 : index
    %156 = vector.load %arg14[%c0_61, %c0_62] : memref<1x16xf32, #tpu.memory_space<vmem>>, vector<1x16xf32>
    %c0_63 = arith.constant 0 : index
    %c0_64 = arith.constant 0 : index
    %157 = vector.load %arg15[%c0_63, %c0_64] : memref<1x16xf32, #tpu.memory_space<vmem>>, vector<1x16xf32>
    %cst_65 = arith.constant dense<0.000000e+00> : vector<2x16xf32>
    %158 = vector.multi_reduction <add>, %155, %cst_65 [2] : vector<2x16x16xf32> to vector<2x16xf32>
    %159 = vector.shape_cast %158 : vector<2x16xf32> to vector<2x16x1xf32>
    %cst_66 = arith.constant 1.600000e+01 : f32
    %160 = vector.broadcast %cst_66 : f32 to vector<2x16x1xf32>
    %161 = arith.divf %159, %160 : vector<2x16x1xf32>
    %162 = vector.broadcast %161 : vector<2x16x1xf32> to vector<2x16x16xf32>
    %163 = arith.subf %155, %162 : vector<2x16x16xf32>
    %164 = arith.mulf %163, %163 : vector<2x16x16xf32>
    %cst_67 = arith.constant dense<0.000000e+00> : vector<2x16xf32>
    %165 = vector.multi_reduction <add>, %164, %cst_67 [2] : vector<2x16x16xf32> to vector<2x16xf32>
    %166 = vector.shape_cast %165 : vector<2x16xf32> to vector<2x16x1xf32>
    %cst_68 = arith.constant 1.600000e+01 : f32
    %167 = vector.broadcast %cst_68 : f32 to vector<2x16x1xf32>
    %168 = arith.divf %166, %167 : vector<2x16x1xf32>
    %169 = vector.broadcast %161 : vector<2x16x1xf32> to vector<2x16x16xf32>
    %170 = arith.subf %155, %169 : vector<2x16x16xf32>
    %cst_69 = arith.constant 9.99999993E-9 : f32
    %171 = vector.broadcast %cst_69 : f32 to vector<2x16x1xf32>
    %172 = arith.addf %168, %171 : vector<2x16x1xf32>
    %173 = math.rsqrt %172 : vector<2x16x1xf32>
    %174 = vector.broadcast %173 : vector<2x16x1xf32> to vector<2x16x16xf32>
    %175 = arith.mulf %170, %174 : vector<2x16x16xf32>
    %176 = vector.shape_cast %156 : vector<1x16xf32> to vector<1x1x16xf32>
    %177 = vector.broadcast %176 : vector<1x1x16xf32> to vector<2x16x16xf32>
    %178 = arith.mulf %175, %177 : vector<2x16x16xf32>
    %179 = vector.shape_cast %157 : vector<1x16xf32> to vector<1x1x16xf32>
    %180 = vector.broadcast %179 : vector<1x1x16xf32> to vector<2x16x16xf32>
    %181 = arith.addf %178, %180 : vector<2x16x16xf32>
    %c0_70 = arith.constant 0 : index
    %c0_71 = arith.constant 0 : index
    %c0_72 = arith.constant 0 : index
    %c0_73 = arith.constant 0 : index
    %182 = vector.load %arg16[%c0_70, %c0_71, %c0_72, %c0_73] : memref<1x2x16x16xf32, #tpu.memory_space<vmem>>, vector<1x2x16x16xf32>
    %183 = vector.shape_cast %182 : vector<1x2x16x16xf32> to vector<2x16x16xf32>
    %184 = vector.shape_cast %181 : vector<2x16x16xf32> to vector<1x2x16x16xf32>
    tpu.vector_store %arg16[%c0_70, %c0_71, %c0_72, %c0_73], %184 {strides = array<i32>} : memref<1x2x16x16xf32, #tpu.memory_space<vmem>>, vector<1x2x16x16xf32>,
    return
  }
  func.func @transform_0(%arg0: i32, %arg1: i32) -> (i32, i32, i32) {
    %c0_i32 = arith.constant 0 : i32
    %c0_i32_0 = arith.constant 0 : i32
    %c0_i32_1 = arith.constant 0 : i32
    %c0_i32_2 = arith.constant 0 : i32
    return %c0_i32, %c0_i32_0, %c0_i32_1 : i32, i32, i32
  }
  func.func @transform_1(%arg0: i32, %arg1: i32) -> (i32, i32, i32) {
    %c0_i32 = arith.constant 0 : i32
    %c0_i32_0 = arith.constant 0 : i32
    %c0_i32_1 = arith.constant 0 : i32
    return %arg0, %c0_i32, %c0_i32_0 : i32, i32, i32
  }
  func.func @transform_2(%arg0: i32, %arg1: i32) -> (i32, i32, i32) {
    %c0_i32 = arith.constant 0 : i32
    %c0_i32_0 = arith.constant 0 : i32
    %c0_i32_1 = arith.constant 0 : i32
    return %arg0, %c0_i32, %c0_i32_0 : i32, i32, i32
  }
  func.func @transform_3(%arg0: i32, %arg1: i32) -> (i32, i32, i32) {
    %c0_i32 = arith.constant 0 : i32
    %c0_i32_0 = arith.constant 0 : i32
    %c0_i32_1 = arith.constant 0 : i32
    return %arg0, %c0_i32, %c0_i32_0 : i32, i32, i32
  }
  func.func @transform_4(%arg0: i32, %arg1: i32) -> (i32, i32, i32, i32) {
    %c0_i32 = arith.constant 0 : i32
    %c0_i32_0 = arith.constant 0 : i32
    %c0_i32_1 = arith.constant 0 : i32
    %c0_i32_2 = arith.constant 0 : i32
    return %arg0, %c0_i32, %c0_i32_0, %c0_i32_1 : i32, i32, i32, i32
  }
  func.func @transform_5(%arg0: i32, %arg1: i32) -> (i32, i32, i32) {
    %c0_i32 = arith.constant 0 : i32
    %c0_i32_0 = arith.constant 0 : i32
    %c0_i32_1 = arith.constant 0 : i32
    return %arg0, %c0_i32, %c0_i32_0 : i32, i32, i32
  }
  func.func @transform_6(%arg0: i32, %arg1: i32) -> (i32, i32) {
    %c0_i32 = arith.constant 0 : i32
    %c0_i32_0 = arith.constant 0 : i32
    %c0_i32_1 = arith.constant 0 : i32
    return %c0_i32, %c0_i32_0 : i32, i32
  }
  func.func @transform_7(%arg0: i32, %arg1: i32) -> (i32, i32) {
    %c0_i32 = arith.constant 0 : i32
    %c0_i32_0 = arith.constant 0 : i32
    %c0_i32_1 = arith.constant 0 : i32
    return %c0_i32, %c0_i32_0 : i32, i32
  }
  func.func @transform_8(%arg0: i32, %arg1: i32) -> (i32, i32) {
    %c0_i32 = arith.constant 0 : i32
    %c0_i32_0 = arith.constant 0 : i32
    %c0_i32_1 = arith.constant 0 : i32
    return %c0_i32, %c0_i32_0 : i32, i32
  }
  func.func @transform_9(%arg0: i32, %arg1: i32) -> (i32, i32) {
    %c0_i32 = arith.constant 0 : i32
    %c0_i32_0 = arith.constant 0 : i32
    %c0_i32_1 = arith.constant 0 : i32
    return %c0_i32, %c0_i32_0 : i32, i32
  }
  func.func @transform_10(%arg0: i32, %arg1: i32) -> (i32, i32) {
    %c0_i32 = arith.constant 0 : i32
    %c0_i32_0 = arith.constant 0 : i32
    %c0_i32_1 = arith.constant 0 : i32
    return %c0_i32, %c0_i32_0 : i32, i32
  }
  func.func @transform_11(%arg0: i32, %arg1: i32) -> (i32, i32) {
    %c0_i32 = arith.constant 0 : i32
    %c0_i32_0 = arith.constant 0 : i32
    %c0_i32_1 = arith.constant 0 : i32
    return %c0_i32, %c0_i32_0 : i32, i32
  }
  func.func @transform_12(%arg0: i32, %arg1: i32) -> (i32, i32) {
    %c0_i32 = arith.constant 0 : i32
    %c0_i32_0 = arith.constant 0 : i32
    %c0_i32_1 = arith.constant 0 : i32
    return %c0_i32, %c0_i32_0 : i32, i32
  }
  func.func @transform_13(%arg0: i32, %arg1: i32) -> (i32, i32) {
    %c0_i32 = arith.constant 0 : i32
    %c0_i32_0 = arith.constant 0 : i32
    %c0_i32_1 = arith.constant 0 : i32
    return %c0_i32, %c0_i32_0 : i32, i32
  }
  func.func @transform_14(%arg0: i32, %arg1: i32) -> (i32, i32, i32, i32) {
    %c0_i32 = arith.constant 0 : i32
    %c0_i32_0 = arith.constant 0 : i32
    %c0_i32_1 = arith.constant 0 : i32
    return %arg0, %c0_i32, %arg1, %c0_i32_0 : i32, i32, i32, i32
  }
}

</mosaic_0001>

<bundles_post_ra>
// kernel: tpu_custom_call.1
= control target key start
LH: loop header
LB: loop body
LE: loop exit
PB: predicated region body
PF: predicated region fallthrough
CT: control target
= control target key end

     0   :  { %19 = vsyncpa [#allocation7], 0  ;;  %s2886_s0 = inlined_call_operand.vmem [shape: f32[2,16,32], index: 0, kind: input, shape index: {}]   ;;  %s2887_s1 = inlined_call_operand.vmem [shape: bf16[2,16,32], index: 1, kind: input, shape index: {}]   ;;  %s2888_s2 = inlined_call_operand.vmem [shape: f32[2,1,16], index: 2, kind: input, shape index: {}]   ;;  %s2889_s3 = inlined_call_operand.vmem [shape: bf16[2,64,16], index: 3, kind: input, shape index: {}]   ;;  %s2890_s4 = inlined_call_operand.vmem [shape: bf16[2,2,2,16], index: 4, kind: input, shape index: {}]   ;;  %s2891_s5 = inlined_call_operand.vmem [shape: f32[2,1,2], index: 5, kind: input, shape index: {}]   ;;  %s2892_s6 = inlined_call_operand.vmem [shape: f32[1,16], index: 6, kind: input, shape index: {}]   ;;  %s2893_s7 = inlined_call_operand.vmem [shape: f32[1,16], index: 7, kind: input, shape index: {}]   ;;  %s2894_s8 = inlined_call_operand.vmem [shape: bf16[16,16], index: 8, kind: input, shape index: {}]   ;;  %s2895_s9 = inlined_call_operand.vmem [shape: f32[1,16], index: 9, kind: input, shape index: {}]   ;;  %s2896_s10 = inlined_call_operand.vmem [shape: bf16[16,16], index: 10, kind: input, shape index: {}]   ;;  %s2897_s11 = inlined_call_operand.vmem [shape: f32[1,16], index: 11, kind: input, shape index: {}]   ;;  %s2898_s12 = inlined_call_operand.vmem [shape: f32[1,16], index: 12, kind: input, shape index: {}]   ;;  %s2899_s13 = inlined_call_operand.vmem [shape: f32[1,16], index: 13, kind: input, shape index: {}]   ;;  %s2900_s14 = inlined_call_operand.hbm [shape: f32[2,2,16,16], index: 14, kind: output, shape index: {}]  }
   0x1   :  { %21 = vsyncpa [#allocation7 + $0x1], 0  ;;  %s2508_s29 = smov 0   ;;  %s2510_s30 = smov 0  }
   0x2   :  { %s2512_s15 = smov 0   ;;  %s2514_s16 = smov 0  }
   0x3   :  { %s2516_s17 = smov 0   ;;  %s2518_s18 = smov 0  }
   0x4 LB: > { %2906 = sst [smem:[#allocation9_spill]] %s2401_s29  ;;  %s2005_s19 = sadd.s32 4294967295, %s2421_s18   ;;  %s2421_s18 = sphi %s2518_s18, %s27_s18   ;;  %s2417_s17 = sphi %s2516_s17, %s2919_s17   ;;  %s2413_s16 = sphi %s2514_s16, %s2918_s16   ;;  %s2409_s15 = sphi %s2512_s15, %s2917_s15   ;;  %s2405_s30 = sphi %s2510_s30, %s2921_s30   ;;  %s2401_s29 = sphi %s2508_s29, %s2920_s29  }
   0x5   : > { %2907 = sst [smem:[#allocation10_spill]] %s2409_s15  ;;  %s2006_s20 = sadd.s32 4294967294, %s2421_s18  }
   0x6   : > { %2908 = sst [smem:[#allocation11_spill]] %s2417_s17  ;;  %s39_s21 = sadd.s32 1, %s2417_s17 }
   0x7   : > { %s367_s22 = sadd.s32 1, %s2409_s15  ;;  %p41_p0 = scmp.ge.s32.totalorder %s39_s21, 2 }
   0x8   : > { %p377_p1 = scmp.ne.s32.totalorder %s2409_s15, %s2405_s30  ;;  %p378_p2 = scmp.eq.s32.totalorder %s2005_s19, 1 }
   0x9   : > { %p383_p3 = scmp.ne.s32.totalorder %s2405_s30, %s2401_s29  ;;  %s2923_s21 = smov (%p41_p0, %s39_s21), 0 }
   0xa   : > { %2909 = sst [smem:[#allocation12_spill]] %s2923_s21  ;;  %p2548_p4 = por %p378_p2, %p377_p1 }
   0xb   : > { %p384_p5 = scmp.eq.s32.totalorder %s2006_s20, 1  ;;  %s362_s24 = ssub.s32 %s2417_s17, %s2923_s21 }
   0xc   : > { %p2009_p6 = scmp.ge.s32.totalorder %s2421_s18, 1  ;;  %p365_p7 = scmp.eq.s32.totalorder %s362_s24, 0 }
   0xd   : > { %p2555_p8 = por %p384_p5, %p383_p3  ;;  %p464_p9 = scmp.lt.s32.totalorder %s2421_s18, 3 }
   0xe   : > { %s2561_s26 = scalar_select %p365_p7, %s2409_s15, %s367_s22  }
   0xf   : > { %s2911_s25 = scalar_select %p2555_p8, 1, 0 }
  0x10   : > { %2913 = sst [smem:[#allocation14_spill]] %s2561_s26  ;;  %p465_p10 = pnand %p2009_p6, %p464_p9 }
  0x11   : > { %2912 = sst [smem:[#allocation13_spill]] %s2911_s25  ;;  %p525_p11 = scmp.lt.s32.totalorder (!%p465_p10), %s2413_s16, 1  ;;  %v552_v0 = vld [vmem:[%s2886_s0] sm:$0xff] (!%p465_p10)  ;;  %v553_v1 = vld [vmem:[%s2886_s0 + $0x8] sm:$0xff] (!%p465_p10)  ;;  %vm572_vm0 = vcmask (!%p465_p10), 261120   ;;  %vm631_vm1 = vcmask (!%p465_p10), 130048   ;;  %v774_v42 = vlaneseq (!%p465_p10) }
  0x12   : > { %468 = sbr.rel (%p465_p10) target bundleno = 3694 (0xe6e), region = 76  ;;  %v556_v2 = vpack.c.bf16 (!%p465_p10), %v553_v1, %v552_v0  ;;  %v554_v4 = vld [vmem:[%s2886_s0 + $0x10] sm:$0xff] (!%p465_p10)  ;;  %v555_v8 = vld [vmem:[%s2886_s0 + $0x18] sm:$0xff] (!%p465_p10)  ;;  %v2423_v27 = vmov (!%p465_p10), 0.0   ;;  %vm2424_vm2 = vmmov (!%p465_p10), 0   ;;  %s2426_s26 = smov (!%p465_p10), 112  }
  0x13   : > { %v557_v10 = vpack.c.bf16 (!%p465_p10), %v555_v8, %v554_v4  ;;  %v2639_v43 = vshrl.u32 (!%p465_p10), %v774_v42, 7  ;;  %v781_v44 = vand.u32 (!%p465_p10), 127, %v774_v42  ;;  %vm1307_vm5 = vcmask (!%p465_p10), 1041409   ;;  %s2061_s20 = sshll.u32 (!%p465_p10), %s2413_s16, 9 }
  0x14   : > { %2101 = vmatprep.mubr.msk.bf16.mxu0 (!%p465_p10), %vm572_vm0, %v556_v2  ;;  %vm1439_vm10 = vcmask (!%p465_p10), 15360  }
  0x15   : > { %v776_v45 = vadd.s32 (!%p465_p10), 8, %v2639_v43  ;;  %vm782_vm3 = vcmp.gt.s32.totalorder (!%p465_p10), %v781_v44, %v2639_v43 }
  0x16   : > { %v2644_v47 = vsel (!%p465_p10), %vm782_vm3, -inf, %v2423_v27 }
  0x17   : > { %vm783_vm4 = vcmp.gt.s32.totalorder (!%p465_p10), %v781_v44, %v776_v45 }
  0x18   : > { %v2647_v51 = vsel (!%p465_p10), %vm783_vm4, -inf, %v2423_v27 }
  0x19   : > { %s2571_s24 = scalar_select %p525_p11, %s2413_s16, 1 }
  0x1b   : > { %s2059_s22 = sshll.u32 %s2571_s24, 3  ;;  %s2060_s21 = sshll.u32 %s2571_s24, 5 }
  0x1c   : > { %s529_s15 = scalar_lea.vmem %s2887_s1, %s2059_s22  ;;  %s537_s25 = scalar_lea.vmem %s2889_s3, %s2060_s21 }
  0x1d   : > { %v2272_v3 = vld [vmem:[%s529_s15] sm:$0xff]   ;;  %v2274_v7 = vld [vmem:[%s537_s25 + $0x8] sm:$0xff]   ;;  %v2275_v12 = vld [vmem:[%s537_s25 + $0x10] sm:$0xff]   ;;  %s532_s21 = scalar_lea.vmem %s2888_s2, %s2571_s24  ;;  %s2015_s22 = sshll.u32 %s2571_s24, 1 }
  0x1e   : > { %v2273_v5 = vld [vmem:[%s537_s25] sm:$0xff]   ;;  %2193 = vmatprep.subr.msk.bf16.mxu0 %vm572_vm0, %v2272_v3  ;;  %v580_v6 = vsel %vm572_vm0, %v2272_v3, 0  ;;  %v676_v11 = vsel %vm631_vm1, %v2274_v7, 0  ;;  %v679_v13 = vsel %vm631_vm1, %v2275_v12, 0  ;;  %v2276_v14 = vld [vmem:[%s537_s25 + $0x18] sm:$0xff]   ;;  %s2425_s25 = smov 96   ;;  %s541_s19 = scalar_lea.vmem %s2890_s4, %s2015_s22 }
  0x1f   : > { %2100 = vmatpush3.bf16.xpose.msra.mxu0 %v580_v6  ;;  %2194 = vmatprep.subr.msk.bf16.mxu1 %vm631_vm1, %v2273_v5  ;;  %v673_v9 = vsel %vm631_vm1, %v2273_v5, 0  ;;  %v682_v15 = vsel %vm631_vm1, %v2276_v14, 0  ;;  %v2016_v16 = vld [vmem:[%s532_s21] ss:$0 sm:$0xff]  ;;  %s544_s29 = scalar_lea.vmem %s2891_s5, %s2571_s24  ;;  %s2041_s24 = sshll.u32 %s2413_s16, 4 }
  0x20   : > { %2106 = vmatpush3.bf16.xpose.msra.mxu1 %v673_v9  ;;  %2117 = vmatprep.subr.bf16.mxu0 %v2423_v27  ;;  %s1538_s15 = scalar_lea.vmem [#allocation2], %s2041_s24  ;;  %s522_s21 = sand.u32 1, %s2405_s30  }
  0x21   : > { %2195 = vmatprep.subr.msk.bf16.mxu1 %vm631_vm1, %v2274_v7  ;;  %s2010_s22 = sshll.u32 %s522_s21, 5  ;;  %s2840_s16 = scalar_lea.sflag [#allocation7], %s522_s21 }
  0x26   : > { %2102 = vmatmul.mubr.msk.bf16.vlgmr.msra.gmra.mrb[0].mxu0 %vm572_vm0, %v557_v10 }
  0x27   : > { %2119 = vmatprep.mubr.msk.bf16.mxu0 %vm2424_vm2, %v2423_v27 }
  0x28   : > { %2108 = vmatpush3.bf16.xpose.msra.mxu1 %v676_v11 }
  0x29   : > { %2196 = vmatprep.subr.msk.bf16.mxu1 %vm631_vm1, %v2275_v12 }
  0x30   : > { %2110 = vmatpush3.bf16.xpose.msra.mxu1 %v679_v13 }
  0x31   : > { %2197 = vmatprep.subr.msk.bf16.mxu1 %vm631_vm1, %v2276_v14 }
  0x38   : > { %2112 = vmatpush3.bf16.xpose.msra.mxu1 %v682_v15 }
  0x39   : > { %2141 = vmatprep.subr.bf16.mxu1 %v2423_v27 }
  0xf9   : > { %v2103_v17 = vpop.f32.mrb[0].mxu0 }
  0xfa   : > { %v625_v18 = vadd.f32 %v2103_v17, %v2016_v16  ;;  %v616_v19 = vpop.f32.mrb[1].mxu0 }
  0xfb   : > { %v617_v20 = vadd.f32 %v2016_v16, %v616_v19  ;;  %v2104_v21 = vpop.f32.mrb[2].mxu0 }
  0xfc   : > { %634 = vst.msk [vmem:[#allocation2 + $0x10] sm:$0xff] %vm631_vm1, %v625_v18  ;;  %v628_v22 = vadd.f32 %v2104_v21, %v2016_v16  ;;  %v619_v23 = vpop.f32.mrb[3].mxu0 }
  0xfd   : > { %632 = vst.msk [vmem:[#allocation2] sm:$0xff] %vm631_vm1, %v617_v20  ;;  %v620_v24 = vadd.f32 %v2016_v16, %v619_v23 }
  0xfe   : > { %635 = vst.msk [vmem:[#allocation2 + $0x18] sm:$0xff] %vm631_vm1, %v628_v22  ;;  %v637_v25 = vpack.c.bf16 %v628_v22, %v625_v18 }
  0xff   : > { %633 = vst.msk [vmem:[#allocation2 + $0x8] sm:$0xff] %vm631_vm1, %v620_v24  ;;  %v636_v26 = vpack.c.bf16 %v620_v24, %v617_v20 }
 0x101   : > { %2113 = vmatprep.mubr.msk.bf16.mxu1 %vm631_vm1, %v636_v26 }
 0x102   : > { %2114 = vmatmul.mubr.msk.bf16.vlgmr.msra.gmra.mrb[0].mxu1 %vm631_vm1, %v637_v25 }
 0x103   : > { %2143 = vmatprep.mubr.msk.bf16.mxu1 %vm2424_vm2, %v2423_v27 }
 0x1d5   : > { %v2115_v28 = vpop.f32.mrb[0].mxu1 }
 0x1d6   : > { %v718_v29 = vpop.f32.mrb[1].mxu1 }
 0x1d7   : > { %v2116_v30 = vpop.f32.mrb[2].mxu1 }
 0x1d8   : > { %v734_v31 = vpack.c.bf16 %v2116_v30, %v2115_v28  ;;  %v721_v32 = vpop.f32.mrb[3].mxu1 }
 0x1d9   : > { %v733_v33 = vpack.c.bf16 %v721_v32, %v718_v29 }
 0x1da   : > { %736 = vst.msk [vmem:[#allocation3 + $0x8] sm:$0xff] %vm631_vm1, %v734_v31 }
 0x1db   : > { %735 = vst.msk [vmem:[#allocation3] sm:$0xff] %vm631_vm1, %v733_v33  ;;  %747 = vrot.lane.b32.xlu0 %v733_v33, %s2425_s25 }
 0x1df   : > { %749 = vrot.lane.b32.xlu0 %v734_v31, %s2425_s25 }
 0x1e1   : > { %v765_v38 = vld [vmem:[#allocation3 + $0x8] sm:$0xff] }
 0x1e2   : > { %v764_v34 = vld [vmem:[#allocation3] sm:$0xff]  ;;  %v2627_v40 = vsel %vm631_vm1, %v765_v38, 0 }
 0x1e3   : > { %v794_v35 = vsel %vm631_vm1, %v764_v34, 0 }
 0x1e4   : > { %2118 = vmatpush3.bf16.xpose.msra.mxu0 %v794_v35  ;;  %2142 = vmatpush3.bf16.xpose.msra.mxu1 %v794_v35 }
 0x1e5   : > { %2123 = vmatprep.subr.bf16.mxu0 %v2423_v27  ;;  %2153 = vmatprep.subr.bf16.mxu1 %v2423_v27 }
 0x24d   : > { %v748_v36 = vpop.permute.xlu0 %747 }
 0x24e   : > { %753 = vst.msk [vmem:[#allocation5] sm:$0xff] %vm572_vm0, %v748_v36 }
 0x251   : > { %v750_v37 = vpop.permute.xlu0 %749 }
 0x252   : > { %754 = vst.msk [vmem:[#allocation5 + $0x8] sm:$0xff] %vm572_vm0, %v750_v37 }
 0x255   : > { %v2622_v39 = vld [vmem:[#allocation5] sm:$0xff] }
 0x256   : > { %2120 = vmatmul.mubr.msk.bf16.vlgmr.msra.gmra.mrb[4].mxu0 %vm631_vm1, %v2622_v39 }
 0x257   : > { %2124 = vmatpush3.bf16.xpose.msra.mxu0 %v2627_v40  ;;  %2125 = vmatprep.mubr.msk.bf16.mxu0 %vm2424_vm2, %v2423_v27 }
 0x258   : > { %2129 = vmatprep.subr.bf16.mxu0 %v2423_v27 }
 0x259   : > { %v2633_v41 = vld [vmem:[#allocation5 + $0x8] sm:$0xff] }
 0x25e   : > { %2126 = vmatmul.mubr.msk.bf16.vlgmr.msra.gmra.mrb[8].mxu0 %vm631_vm1, %v2633_v41 }
 0x25f   : > { %2131 = vmatprep.mubr.msk.bf16.mxu0 %vm2424_vm2, %v2423_v27 }
 0x329   : > { %v830_v46 = vpop.f32.mrb[4].mxu0 }
 0x32a   : > { %v884_v48 = vmul.f32 4.0, %v830_v46  ;;  %v2121_v49 = vpop.f32.mrb[5].mxu0 }
 0x32b   : > { %v833_v50 = vpop.f32.mrb[6].mxu0 }
 0x32c   : > { %v885_v52 = vmul.f32 4.0, %v833_v50  ;;  %v2122_v53 = vpop.f32.mrb[7].mxu0  ;;  %v888_v54 = vadd.f32 %v884_v48, %v2644_v47 }
 0x32e   : > { %v892_v55 = vsel %vm631_vm1, %v888_v54, -inf  ;;  %v889_v56 = vadd.f32 %v885_v52, %v2647_v51 }
 0x32f   : > { %893 = vmax.xlane.f32.xlu1 %v892_v55 }
 0x330   : > { %v895_v60 = vsel %vm631_vm1, %v889_v56, -inf }
 0x331   : > { %v877_v57 = vpop.f32.mrb[8].mxu0 }
 0x332   : > { %v886_v58 = vmul.f32 4.0, %v877_v57  ;;  %v2127_v59 = vpop.f32.mrb[9].mxu0 }
 0x333   : > { %896 = vmax.xlane.f32.xlu1 %v895_v60  ;;  %v880_v61 = vpop.f32.mrb[10].mxu0 }
 0x334   : > { %v887_v62 = vmul.f32 4.0, %v880_v61  ;;  %v2128_v63 = vpop.f32.mrb[11].mxu0  ;;  %v890_v0 = vadd.f32 %v886_v58, %v2644_v47 }
 0x336   : > { %v898_v1 = vsel %vm631_vm1, %v890_v0, -inf  ;;  %v891_v2 = vadd.f32 %v887_v62, %v2647_v51 }
 0x337   : > { %899 = vmax.xlane.f32.xlu0 %v898_v1 }
 0x338   : > { %v901_v3 = vsel %vm631_vm1, %v891_v2, -inf }
 0x339   : > { %902 = vmax.xlane.f32.xlu1 %v901_v3 }
 0x34a   : > { %739 = vrot.lane.b32.xlu1 %v733_v33, %s2426_s26 }
 0x34d   : > { %741 = vrot.lane.b32.xlu0 %v734_v31, %s2426_s26 }
 0x3bc   : > { %v894_v4 = vpop.xlane.xlu1 %893 }
 0x3bd   : > { %v904_v5 = vsub.f32 %v888_v54, %v894_v4 }
 0x3bf   : > { %v908_v6 = vmul.f32 1.442695, %v904_v5 }
 0x3c0   : > { %v897_v7 = vpop.xlane.xlu1 %896 }
 0x3c1   : > { %2279 = vpow2.f32 %v908_v6  ;;  %v905_v8 = vsub.f32 %v889_v56, %v897_v7 }
 0x3c3   : > { %v910_v9 = vmul.f32 1.442695, %v905_v8 }
 0x3c4   : > { %v900_v10 = vpop.xlane.xlu0 %899 }
 0x3c5   : > { %2281 = vpow2.f32 %v910_v9  ;;  %v906_v11 = vsub.f32 %v890_v0, %v900_v10 }
 0x3c6   : > { %v903_v12 = vpop.xlane.xlu1 %902 }
 0x3c7   : > { %v912_v13 = vmul.f32 1.442695, %v906_v11  ;;  %v907_v14 = vsub.f32 %v891_v2, %v903_v12 }
 0x3c8   : > { %v742_v15 = vpop.permute.xlu0 %741 }
 0x3c9   : > { %2283 = vpow2.f32 %v912_v13  ;;  %v914_v16 = vmul.f32 1.442695, %v907_v14  ;;  %746 = vst.msk [vmem:[#allocation4 + $0x8] sm:$0xff] %vm631_vm1, %v742_v15 }
 0x3ca   : > { %v740_v17 = vpop.permute.xlu1 %739 }
 0x3cb   : > { %v2280_v18 = vpop.eup %2279  ;;  %2285 = vpow2.f32 %v914_v16  ;;  %745 = vst.msk [vmem:[#allocation4] sm:$0xff] %vm631_vm1, %v740_v17 }
 0x3cc   : > { %v916_v19 = vsel %vm631_vm1, %v2280_v18, 0.0 }
 0x3cd   : > { %917 = vadd.xlane.f32.xlu1 %v916_v19 }
 0x3cf   : > { %v2282_v20 = vpop.eup %2281 }
 0x3d0   : > { %v919_v21 = vsel %vm631_vm1, %v2282_v20, 0.0  ;;  %v767_v38 = vld [vmem:[#allocation4 + $0x8] sm:$0xff] }
 0x3d1   : > { %920 = vadd.xlane.f32.xlu1 %v919_v21 }
 0x3d2   : > { %v766_v22 = vld [vmem:[#allocation4] sm:$0xff] }
 0x3d3   : > { %v2284_v23 = vpop.eup %2283  ;;  %2130 = vmatpush3.bf16.msra.mxu0 %v766_v22 }
 0x3d4   : > { %v922_v24 = vsel %vm631_vm1, %v2284_v23, 0.0  ;;  %2135 = vmatprep.subr.bf16.mxu0 %v2423_v27 }
 0x3d5   : > { %v2286_v25 = vpop.eup %2285  ;;  %923 = vadd.xlane.f32.xlu1 %v922_v24 }
 0x3d6   : > { %v925_v26 = vsel %vm631_vm1, %v2286_v25, 0.0 }
 0x3d9   : > { %926 = vadd.xlane.f32.xlu1 %v925_v26 }
 0x3ea   : > { %1033 = vrot.lane.b32.xlu1 %v2622_v39, %s2426_s26 }
 0x3ee   : > { %1080 = vrot.lane.b32.xlu1 %v2633_v41, %s2426_s26  ;;  %s2430_s26 = smov [#allocation6]  }
 0x45a   : > { %v918_v28 = vpop.xlane.xlu1 %917 }
 0x45b   : > { %2287 = vrcp.f32 %v918_v28 }
 0x45e   : > { %v921_v29 = vpop.xlane.xlu1 %920 }
 0x45f   : > { %2289 = vrcp.f32 %v921_v29 }
 0x462   : > { %v924_v30 = vpop.xlane.xlu1 %923 }
 0x463   : > { %2291 = vrcp.f32 %v924_v30 }
 0x465   : > { %v2288_v32 = vpop.eup %2287 }
 0x466   : > { %v927_v31 = vpop.xlane.xlu1 %926  ;;  %v932_v34 = vmul.f32 %v2288_v32, %v2280_v18 }
 0x467   : > { %2293 = vrcp.f32 %v927_v31 }
 0x469   : > { %v2290_v33 = vpop.eup %2289 }
 0x46a   : > { %v933_v35 = vmul.f32 %v2290_v33, %v2282_v20  ;;  %v1034_v36 = vpop.permute.xlu1 %1033 }
 0x46b   : > { %2144 = vmatmul.mubr.msk.bf16.vlgmr.msra.gmra.mrb[4].mxu1 %vm631_vm1, %v1034_v36 }
 0x46c   : > { %2154 = vmatpush3.bf16.msra.mxu1 %v766_v22  ;;  %v936_v37 = vpack.c.bf16 %v933_v35, %v932_v34  ;;  %2155 = vmatprep.mubr.msk.bf16.mxu1 %vm2424_vm2, %v2423_v27 }
 0x46d   : > { %v2292_v39 = vpop.eup %2291 }
 0x46e   : > { %2132 = vmatmul.mubr.msk.bf16.vlgmr.msra.gmra.mrb[12].mxu0 %vm631_vm1, %v936_v37  ;;  %v934_v42 = vmul.f32 %v2292_v39, %v2284_v23  ;;  %v1081_v46 = vpop.permute.xlu1 %1080 }
 0x46f   : > { %2136 = vmatpush3.bf16.msra.mxu0 %v767_v38  ;;  %2137 = vmatprep.mubr.msk.bf16.mxu0 %vm2424_vm2, %v2423_v27 }
 0x470   : > { %2147 = vmatprep.subr.bf16.mxu0 %v2423_v27 }
 0x471   : > { %v2294_v41 = vpop.eup %2293 }
 0x472   : > { %v935_v44 = vmul.f32 %v2294_v41, %v2286_v25 }
 0x474   : > { %v937_v45 = vpack.c.bf16 %v935_v44, %v934_v42 }
 0x476   : > { %2138 = vmatmul.mubr.msk.bf16.vlgmr.msra.gmra.mrb[16].mxu0 %vm631_vm1, %v937_v45 }
 0x477   : > { %2149 = vmatprep.mubr.msk.bf16.mxu0 %vm2424_vm2, %v2423_v27 }
 0x478   : > { %2148 = vmatpush3.bf16.xpose.msra.mxu0 %v2627_v40 }
 0x479   : > { %2159 = vmatprep.subr.bf16.mxu0 %v2423_v27 }
 0x47f   : > { %2150 = vmatmul.mubr.msk.bf16.vlgmr.msra.gmra.mrb[20].mxu0 %vm631_vm1, %v1081_v46  ;;  %v2427_v46 = vmov 1966171168  }
 0x480   : > { %2160 = vmatpush3.bf16.msra.mxu0 %v767_v38  ;;  %2161 = vmatprep.mubr.msk.bf16.mxu0 %vm2424_vm2, %v2423_v27 }
 0x53e   : > { %v1072_v48 = vpop.f32.mrb[4].mxu1 }
 0x53f   : > { %v1126_v49 = vmul.f32 4.0, %v1072_v48  ;;  %v2145_v50 = vpop.f32.mrb[5].mxu1  ;;  %v1284_v48 = vunpack.c.l.s4 %v2427_v46 }
 0x540   : > { %v1075_v52 = vpop.f32.mrb[6].mxu1 }
 0x541   : > { %v1127_v53 = vmul.f32 4.0, %v1075_v52  ;;  %v2685_v54 = vpop.f32.mrb[12].mxu0  ;;  %v2146_v55 = vpop.f32.mrb[7].mxu1  ;;  %v1130_v56 = vadd.f32 %v1126_v49, %v2644_v47  ;;  %v1285_v49 = vunpack.c.0.s8 %v1284_v48 }
 0x542   : > { %v2133_v40 = vpop.f32.mrb[13].mxu0  ;;  %v2034_v52 = vld.sshfl [vmem:[%s541_s19] sm:$0x1 pattern:$0x75316420] }
 0x543   : > { %v2688_v57 = vpop.f32.mrb[14].mxu0  ;;  %v1134_v58 = vsel %vm631_vm1, %v1130_v56, -inf  ;;  %v1131_v59 = vadd.f32 %v1127_v53, %v2647_v51  ;;  %v1288_v50 = vsub.s32 %v1285_v49, %v2639_v43  ;;  %v2035_v53 = vld.sshfl [vmem:[%s541_s19 + $0x1] sm:$0x1 pattern:$0x75316420] }
 0x544   : > { %1135 = vmax.xlane.f32.xlu1 %v1134_v58  ;;  %v2134_v60 = vpop.f32.mrb[15].mxu0  ;;  %v756_v43 = vld [vmem:[#allocation2] sm:$0xff]  ;;  %s524_s19 = scalar_lea.vmem [#allocation6], %s2010_s22  ;;  %s2347_s22 = sshll.u32 %s2430_s26, 4  ;;  %s2348_s22 = int_to_ptr.vmem [resolvable:$false] %s2347_s22 }
 0x545   : > { %v1137_v27 = vsel %vm631_vm1, %v1131_v59, -inf  ;;  %v1289_v55 = vrot.slane %v2034_v52, %v1288_v50  ;;  %vm760_vm6 = vcmp.eq.f32.partialorder %v756_v43, 0.0  ;;  %s1882_s17 = sshll.u32 %s524_s19, 4  ;;  %s2349_s27 = scalar_lea.vmem %s2348_s22, 1024  ;;  %s2836_s17 = int_to_ptr.vmem [resolvable:$true] %s1882_s17 }
 0x546   : > { %1138 = vmax.xlane.f32.xlu0 %v1137_v27  ;;  %s2343_s25 = scalar_lea.vmem %s2836_s17, 512  ;;  %p2350_p1 = scmp.lt.s32.totalorder %s2836_s17, %s2348_s22 }
 0x547   : > { %v1304_v40 = vunpack.c.l.b16 %v1289_v55  ;;  %p2344_p12 = scmp.ne.s32.totalorder %s2836_s17, %s2343_s25  ;;  %p2351_p2 = scmp.lt.s32.totalorder %s2349_s27, %s2343_s25 }
 0x549   : > { %v2693_v61 = vpop.f32.mrb[16].mxu0  ;;  %p2345_p13 = pnand %p2344_p12, %p2548_p4  ;;  %p2352_p3 = por %p2351_p2, %p2350_p1 }
 0x54a   : > { %v2139_v62 = vpop.f32.mrb[17].mxu0 }
 0x54b   : > { %v2695_v63 = vpop.f32.mrb[18].mxu0  ;;  %p2346_p0 = pneg %p2345_p13 }
 0x54c   : > { %v2140_v0 = vpop.f32.mrb[19].mxu0 }
 0x54d   : > { %p2353_p5 = pnand %p2352_p3, %p2346_p0 }
 0x552   : > { %v1119_v1 = vpop.f32.mrb[20].mxu0 }
 0x553   : > { %v1128_v2 = vmul.f32 4.0, %v1119_v1  ;;  %v2151_v3 = vpop.f32.mrb[21].mxu0 }
 0x554   : > { %v1122_v4 = vpop.f32.mrb[22].mxu0  ;;  %v757_v3 = vld [vmem:[#allocation2 + $0x8] sm:$0xff] }
 0x555   : > { %v1129_v5 = vmul.f32 4.0, %v1122_v4  ;;  %v2152_v6 = vpop.f32.mrb[23].mxu0  ;;  %v1132_v7 = vadd.f32 %v1128_v2, %v2644_v47  ;;  %vm761_vm7 = vcmp.eq.f32.partialorder %v757_v3, 0.0 }
 0x557   : > { %v1140_v8 = vsel %vm631_vm1, %v1132_v7, -inf  ;;  %v1133_v9 = vadd.f32 %v1129_v5, %v2647_v51 }
 0x558   : > { %1141 = vmax.xlane.f32.xlu1 %v1140_v8 }
 0x559   : > { %v1143_v10 = vsel %vm631_vm1, %v1133_v9, -inf }
 0x55a   : > { %1144 = vmax.xlane.f32.xlu0 %v1143_v10 }
 0x5d1   : > { %v1136_v11 = vpop.xlane.xlu1 %1135 }
 0x5d2   : > { %v1146_v12 = vsub.f32 %v1130_v56, %v1136_v11  ;;  %v1303_v56 = vrot.slane %v2035_v53, %v1288_v50  ;;  %v758_v11 = vld [vmem:[#allocation2 + $0x10] sm:$0xff] }
 0x5d3   : > { %v1139_v13 = vpop.xlane.xlu0 %1138  ;;  %vm762_vm8 = vcmp.eq.f32.partialorder %v758_v11, 0.0 }
 0x5d4   : > { %v1150_v14 = vmul.f32 1.442695, %v1146_v12  ;;  %v1147_v15 = vsub.f32 %v1131_v59, %v1139_v13  ;;  %v1305_v58 = vunpack.c.l.b16 %v1303_v56  ;;  %v1306_v59 = vrot.slane %v1304_v40, 1  ;;  %v759_v12 = vld [vmem:[#allocation2 + $0x18] sm:$0xff] }
 0x5d5   : > { %vm763_vm9 = vcmp.eq.f32.partialorder %v759_v12, 0.0 }
 0x5d6   : > { %2295 = vpow2.f32 %v1150_v14  ;;  %v1152_v16 = vmul.f32 1.442695, %v1147_v15  ;;  %v1308_v60 = vsel %vm1307_vm5, %v1305_v58, %v1306_v59  ;;  %v1368_v0 = vrot.slane %v1305_v58, 7 }
 0x5d7   : > { %v1309_v27 = vpack.c.b16 %v1308_v60, %v1308_v60  ;;  %v2724_v15 = vsel %vm761_vm7, 0.0, %v2688_v57  ;;  %v2428_v60 = vmov 0  }
 0x5d8   : > { %2297 = vpow2.f32 %v1152_v16  ;;  %v1369_v1 = vsel %vm1307_vm5, %v1368_v0, %v1304_v40  ;;  %2266 = vset.pattern.permute.xlu1 %v2428_v60  ;;  %2267 = vset.pattern.permute.xlu0 %v2428_v60 }
 0x5d9   : > { %2198 = vmatprep.subr.msk.bf16.mxu1 %vm631_vm1, %v1309_v27  ;;  %v1317_v62 = vsel %vm631_vm1, %v1309_v27, 0  ;;  %v1370_v2 = vpack.c.b16 %v1369_v1, %v1369_v1 }
 0x5e0   : > { %v2296_v17 = vpop.eup %2295 }
 0x5e1   : > { %v1158_v18 = vsel %vm631_vm1, %v2296_v17, 0.0 }
 0x5e2   : > { %v2298_v47 = vpop.eup %2297  ;;  %1159 = vadd.xlane.f32.xlu1 %v1158_v18 }
 0x5e3   : > { %v1161_v19 = vsel %vm631_vm1, %v2298_v47, 0.0 }
 0x5e4   : > { %1162 = vadd.xlane.f32.xlu0 %v1161_v19  ;;  %v2732_v19 = vsel %vm760_vm6, 0.0, %v2685_v54 }
 0x5e5   : > { %v1142_v51 = vpop.xlane.xlu1 %1141  ;;  %v1030_v57 = vpack.c.bf16 %v2724_v15, %v2732_v19 }
 0x5e6   : > { %v1148_v20 = vsub.f32 %v1132_v7, %v1142_v51 }
 0x5e7   : > { %v1145_v21 = vpop.xlane.xlu0 %1144 }
 0x5e8   : > { %v1154_v22 = vmul.f32 1.442695, %v1148_v20  ;;  %v1149_v23 = vsub.f32 %v1133_v9, %v1145_v21  ;;  %v1378_v20 = vsel %vm631_vm1, %v1370_v2, 0  ;;  %v2742_v21 = vsel %vm763_vm9, 0.0, %v2695_v63 }
 0x5ea   : > { %2299 = vpow2.f32 %v1154_v22  ;;  %v1156_v24 = vmul.f32 1.442695, %v1149_v23  ;;  %v2745_v22 = vsel %vm762_vm8, 0.0, %v2693_v61  ;;  %v2040_v23 = vld [vmem:[%s544_s29] ss:$0 sm:$0xff] }
 0x5eb   : > { %v1031_v54 = vpack.c.bf16 %v2742_v21, %v2745_v22 }
 0x5ec   : > { %2301 = vpow2.f32 %v1156_v24 }
 0x5f4   : > { %v2300_v25 = vpop.eup %2299 }
 0x5f5   : > { %v1164_v26 = vsel %vm631_vm1, %v2300_v25, 0.0 }
 0x5f6   : > { %v2302_v28 = vpop.eup %2301  ;;  %1165 = vadd.xlane.f32.xlu1 %v1164_v26 }
 0x5f7   : > { %v1167_v29 = vsel %vm631_vm1, %v2302_v28, 0.0 }
 0x5f8   : > { %1168 = vadd.xlane.f32.xlu0 %v1167_v29 }
 0x66f   : > { %v1160_v30 = vpop.xlane.xlu1 %1159 }
 0x670   : > { %2303 = vrcp.f32 %v1160_v30 }
 0x671   : > { %v1163_v31 = vpop.xlane.xlu0 %1162 }
 0x672   : > { %2305 = vrcp.f32 %v1163_v31 }
 0x67a   : > { %v2304_v32 = vpop.eup %2303 }
 0x67b   : > { %v1174_v34 = vmul.f32 %v2304_v32, %v2296_v17 }
 0x67c   : > { %v2306_v33 = vpop.eup %2305 }
 0x67d   : > { %v1175_v35 = vmul.f32 %v2306_v33, %v2298_v47 }
 0x67f   : > { %v1178_v36 = vpack.c.bf16 %v1175_v35, %v1174_v34 }
 0x681   : > { %2156 = vmatmul.mubr.msk.bf16.vlgmr.msra.gmra.mrb[8].mxu1 %vm631_vm1, %v1178_v36 }
 0x682   : > { %2166 = vmatpush3.bf16.xpose.msra.mxu1 %v1317_v62 }
 0x683   : > { %v1166_v37 = vpop.xlane.xlu1 %1165  ;;  %2199 = vmatprep.subr.msk.bf16.mxu1 %vm631_vm1, %v1370_v2 }
 0x684   : > { %2307 = vrcp.f32 %v1166_v37 }
 0x685   : > { %v1169_v38 = vpop.xlane.xlu0 %1168 }
 0x686   : > { %2309 = vrcp.f32 %v1169_v38 }
 0x68e   : > { %v2308_v39 = vpop.eup %2307 }
 0x68f   : > { %v1176_v42 = vmul.f32 %v2308_v39, %v2300_v25 }
 0x690   : > { %v2310_v41 = vpop.eup %2309 }
 0x691   : > { %v1177_v44 = vmul.f32 %v2310_v41, %v2302_v28 }
 0x693   : > { %v1179_v45 = vpack.c.bf16 %v1177_v44, %v1176_v42 }
 0x695   : > { %2162 = vmatmul.mubr.msk.bf16.vlgmr.msra.gmra.mrb[24].mxu0 %vm631_vm1, %v1179_v45 }
 0x754   : > { %v1217_v4 = vpop.f32.mrb[8].mxu1 }
 0x755   : > { %v2157_v5 = vpop.f32.mrb[9].mxu1  ;;  %v2716_v7 = vsel %vm760_vm6, 0.0, %v1217_v4 }
 0x756   : > { %v1220_v6 = vpop.f32.mrb[10].mxu1  ;;  %v2429_v5 = vmov 1  }
 0x757   : > { %v2718_v8 = vsel %vm761_vm7, 0.0, %v1220_v6  ;;  %v2158_v9 = vpop.f32.mrb[11].mxu1 }
 0x758   : > { %v1272_v10 = vpack.c.bf16 %v2718_v8, %v2716_v7 }
 0x75a   : > { %2167 = vmatprep.mubr.msk.bf16.mxu1 %vm631_vm1, %v1272_v10 }
 0x768   : > { %v1261_v13 = vpop.f32.mrb[24].mxu0 }
 0x769   : > { %v2163_v14 = vpop.f32.mrb[25].mxu0  ;;  %v2726_v17 = vsel %vm762_vm8, 0.0, %v1261_v13 }
 0x76a   : > { %v1264_v16 = vpop.f32.mrb[26].mxu0 }
 0x76b   : > { %v2728_v18 = vsel %vm763_vm9, 0.0, %v1264_v16  ;;  %v2164_v47 = vpop.f32.mrb[27].mxu0 }
 0x76c   : > { %v1273_v51 = vpack.c.bf16 %v2728_v18, %v2726_v17 }
 0x76e   : > { %2168 = vmatmul.mubr.msk.bf16.vlgmr.msra.gmra.mrb[12].mxu1 %vm631_vm1, %v1273_v51  ;;  %v1539_v51 = vld [vmem:[%s1538_s15] sm:$0xff] }
 0x76f   : > { %2172 = vmatpush3.bf16.xpose.msra.mxu1 %v1378_v20  ;;  %2173 = vmatprep.mubr.msk.bf16.mxu1 %vm631_vm1, %v1030_v57 }
 0x77a   : > { %2174 = vmatmul.mubr.msk.bf16.vlgmr.msra.gmra.mrb[12].mxu1 %vm631_vm1, %v1031_v54 }
 0x84d   : > { %v2175_v24 = vpop.f32.mrb[12].mxu1 }
 0x84e   : > { %v1414_v25 = vpop.f32.mrb[13].mxu1  ;;  %v1437_v29 = vadd.f32 %v2175_v24, %v2040_v23 }
 0x84f   : > { %v1435_v26 = vadd.f32 %v2040_v23, %v1414_v25  ;;  %v2176_v28 = vpop.f32.mrb[14].mxu1 }
 0x850   : > { %v1417_v63 = vpop.f32.mrb[15].mxu1  ;;  %v1438_v31 = vadd.f32 %v2176_v28, %v2040_v23  ;;  %v1446_v33 = vsel %vm1439_vm10, %v1437_v29, -inf }
 0x851   : > { %v1436_v30 = vadd.f32 %v2040_v23, %v1417_v63  ;;  %v1440_v61 = vsel %vm1439_vm10, %v1435_v26, -inf }
 0x852   : > { %1441 = vmax.xlane.f32.xlu1 %v1440_v61  ;;  %v1449_v34 = vsel %vm1439_vm10, %v1438_v31, -inf }
 0x853   : > { %v1443_v32 = vsel %vm1439_vm10, %v1436_v30, -inf }
 0x854   : > { %1444 = vmax.xlane.f32.xlu0 %v1443_v32 }
 0x856   : > { %1447 = vmax.xlane.f32.xlu1 %v1446_v33  ;;  %v1540_v33 = vld [vmem:[%s1538_s15 + $0x8] sm:$0xff]  ;;  %s2834_s15 = scalar_lea.hbm %s2900_s14, %s2061_s20 }
 0x858   : > { %1450 = vmax.xlane.f32.xlu0 %v1449_v34 }
 0x8df   : > { %v1442_v35 = vpop.xlane.xlu1 %1441 }
 0x8e0   : > { %v1452_v36 = vsub.f32 %v1435_v26, %v1442_v35 }
 0x8e1   : > { %v1445_v37 = vpop.xlane.xlu0 %1444 }
 0x8e2   : > { %v1456_v38 = vmul.f32 1.442695, %v1452_v36  ;;  %v1453_v39 = vsub.f32 %v1436_v30, %v1445_v37 }
 0x8e3   : > { %v1448_v41 = vpop.xlane.xlu1 %1447 }
 0x8e4   : > { %2311 = vpow2.f32 %v1456_v38  ;;  %v1458_v42 = vmul.f32 1.442695, %v1453_v39  ;;  %v1454_v44 = vsub.f32 %v1437_v29, %v1448_v41 }
 0x8e5   : > { %v1451_v45 = vpop.xlane.xlu0 %1450 }
 0x8e6   : > { %2313 = vpow2.f32 %v1458_v42  ;;  %v1460_v46 = vmul.f32 1.442695, %v1454_v44  ;;  %v1455_v48 = vsub.f32 %v1438_v31, %v1451_v45 }
 0x8e8   : > { %2315 = vpow2.f32 %v1460_v46  ;;  %v1462_v49 = vmul.f32 1.442695, %v1455_v48 }
 0x8ea   : > { %2317 = vpow2.f32 %v1462_v49 }
 0x8ee   : > { %v2312_v50 = vpop.eup %2311 }
 0x8ef   : > { %v1464_v52 = vsel %vm1439_vm10, %v2312_v50, 0.0 }
 0x8f0   : > { %v2314_v53 = vpop.eup %2313  ;;  %1465 = vadd.xlane.f32.xlu1 %v1464_v52 }
 0x8f1   : > { %v1467_v55 = vsel %vm1439_vm10, %v2314_v53, 0.0 }
 0x8f2   : > { %v2316_v56 = vpop.eup %2315  ;;  %1468 = vadd.xlane.f32.xlu0 %v1467_v55 }
 0x8f3   : > { %v1470_v40 = vsel %vm1439_vm10, %v2316_v56, 0.0 }
 0x8f4   : > { %v2318_v58 = vpop.eup %2317  ;;  %1471 = vadd.xlane.f32.xlu1 %v1470_v40 }
 0x8f5   : > { %v1473_v59 = vsel %vm1439_vm10, %v2318_v58, 0.0 }
 0x8f6   : > { %1474 = vadd.xlane.f32.xlu0 %v1473_v59 }
 0x97d   : > { %v1466_v27 = vpop.xlane.xlu1 %1465 }
 0x97e   : > { %2319 = vrcp.f32 %v1466_v27 }
 0x97f   : > { %v1469_v62 = vpop.xlane.xlu0 %1468 }
 0x980   : > { %2321 = vrcp.f32 %v1469_v62 }
 0x981   : > { %v1472_v0 = vpop.xlane.xlu1 %1471 }
 0x982   : > { %2323 = vrcp.f32 %v1472_v0 }
 0x983   : > { %v1475_v1 = vpop.xlane.xlu0 %1474 }
 0x984   : > { %2325 = vrcp.f32 %v1475_v1 }
 0x988   : > { %v2320_v2 = vpop.eup %2319 }
 0x989   : > { %v1480_v43 = vmul.f32 %v2320_v2, %v2312_v50 }
 0x98a   : > { %v2322_v3 = vpop.eup %2321 }
 0x98b   : > { %1486 = vperm.xlu1 %2266, %v1480_v43   ;;  %v1481_v4 = vmul.f32 %v2322_v3, %v2314_v53 }
 0x98c   : > { %v2324_v6 = vpop.eup %2323 }
 0x98d   : > { %1491 = vperm.xlu0 %2267, %v1481_v4   ;;  %v1482_v9 = vmul.f32 %v2324_v6, %v2316_v56 }
 0x98e   : > { %v2326_v10 = vpop.eup %2325 }
 0x98f   : > { %2268 = vset.pattern.permute.xlu1 %v2429_v5  ;;  %v1483_v11 = vmul.f32 %v2326_v10, %v2318_v58 }
 0x990   : > { %1513 = vperm.xlu1 %2268, %v1480_v43  }
 0x991   : > { %2271 = vset.pattern.permute.xlu0 %v2429_v5 }
 0x994   : > { %2269 = vset.pattern.permute.xlu1 %v2428_v60  ;;  %v2277_v60 = vld [vmem:[%s2894_s8] sm:$0xff]  }
 0x995   : > { %1496 = vperm.xlu1 %2269, %v1482_v9   ;;  %2200 = vmatprep.subr.msk.bf16.mxu0 %vm631_vm1, %v2277_v60  ;;  %v1647_v27 = vsel %vm631_vm1, %v2277_v60, 0 }
 0x996   : > { %2178 = vmatpush3.bf16.xpose.msra.mxu0 %v1647_v27 }
 0x999   : > { %1501 = vperm.xlu1 %2269, %v1483_v11  }
 0x99d   : > { %2270 = vset.pattern.permute.xlu1 %v2429_v5 }
 0x99e   : > { %1521 = vperm.xlu1 %2270, %v1482_v9  }
 0x9a2   : > { %1517 = vperm.xlu1 %2270, %v1481_v4  }
 0x9a6   : > { %1525 = vperm.xlu1 %2270, %v1483_v11  }
 0xa0a   : > { %v1487_v12 = vpop.permute.xlu1 %1486 }
 0xa0b   : > { %v1504_v14 = vmul.f32 %v1487_v12, %v2732_v19 }
 0xa0c   : > { %v1492_v28 = vpop.permute.xlu0 %1491 }
 0xa0d   : > { %v1505_v19 = vmul.f32 %v1492_v28, %v2724_v15 }
 0xa0f   : > { %v1514_v13 = vpop.permute.xlu1 %1513 }
 0xa10   : > { %v1528_v16 = vmul.f32 %v1514_v13, %v2716_v7 }
 0xa12   : > { %v1532_v47 = vadd.f32 %v1528_v16, %v1504_v14  ;;  %v2042_v16 = vld [vmem:[%s2892_s6] ss:$0 sm:$0xff] }
 0xa14   : > { %v1497_v20 = vpop.permute.xlu1 %1496  ;;  %v1541_v57 = vadd.f32 %v1539_v51, %v1532_v47 }
 0xa15   : > { %v1506_v25 = vmul.f32 %v1497_v20, %v2745_v22 }
 0xa16   : > { %v1547_v54 = vsel %vm631_vm1, %v1541_v57, 0.0 }
 0xa17   : > { %1548 = vadd.xlane.f32.xlu1 %v1547_v54  ;;  %v2043_v54 = vld [vmem:[%s2893_s7] ss:$0 sm:$0xff] }
 0xa18   : > { %v1502_v23 = vpop.permute.xlu1 %1501 }
 0xa19   : > { %v1507_v34 = vmul.f32 %v1502_v23, %v2742_v21 }
 0xa1d   : > { %v1522_v24 = vpop.permute.xlu1 %1521 }
 0xa1e   : > { %v1530_v26 = vmul.f32 %v1522_v24, %v2726_v17 }
 0xa20   : > { %v1534_v63 = vadd.f32 %v1530_v26, %v1506_v25 }
 0xa21   : > { %v1518_v29 = vpop.permute.xlu1 %1517 }
 0xa22   : > { %v1529_v7 = vmul.f32 %v1518_v29, %v2718_v8  ;;  %v1543_v30 = vadd.f32 %v1539_v51, %v1534_v63 }
 0xa24   : > { %v1533_v61 = vadd.f32 %v1529_v7, %v1505_v19  ;;  %v1553_v31 = vsel %vm631_vm1, %v1543_v30, 0.0 }
 0xa25   : > { %1554 = vadd.xlane.f32.xlu1 %v1553_v31  ;;  %v1526_v32 = vpop.permute.xlu1 %1525  ;;  %v2278_v31 = vld [vmem:[%s2896_s10] sm:$0xff]  }
 0xa26   : > { %v1531_v22 = vmul.f32 %v1526_v32, %v2728_v18  ;;  %v1542_v35 = vadd.f32 %v1540_v33, %v1533_v61  ;;  %2201 = vmatprep.subr.msk.bf16.mxu0 %vm631_vm1, %v2278_v31  ;;  %v1729_v32 = vsel %vm631_vm1, %v2278_v31, 0 }
 0xa28   : > { %v1535_v17 = vadd.f32 %v1531_v22, %v1507_v34  ;;  %v1550_v36 = vsel %vm631_vm1, %v1542_v35, 0.0 }
 0xa29   : > { %1551 = vadd.xlane.f32.xlu0 %v1550_v36 }
 0xa2a   : > { %v1544_v37 = vadd.f32 %v1540_v33, %v1535_v17  ;;  %v2044_v33 = vld [vmem:[%s2895_s9] ss:$0 sm:$0xff] }
 0xa2c   : > { %v1556_v15 = vsel %vm631_vm1, %v1544_v37, 0.0 }
 0xa2d   : > { %1557 = vadd.xlane.f32.xlu0 %v1556_v15 }
 0xaa4   : > { %v1549_v8 = vpop.xlane.xlu1 %1548 }
 0xaa5   : > { %v1560_v38 = vmul.f32 0.0625, %v1549_v8 }
 0xaa7   : > { %v1564_v39 = vsub.f32 %v1541_v57, %v1560_v38 }
 0xaa9   : > { %v1568_v41 = vmul.f32 %v1564_v39, %v1564_v39 }
 0xaab   : > { %v1572_v42 = vsel %vm631_vm1, %v1568_v41, 0.0 }
 0xaac   : > { %1573 = vadd.xlane.f32.xlu1 %v1572_v42 }
 0xab2   : > { %v1555_v44 = vpop.xlane.xlu1 %1554 }
 0xab3   : > { %v1562_v21 = vmul.f32 0.0625, %v1555_v44 }
 0xab5   : > { %v1566_v45 = vsub.f32 %v1543_v30, %v1562_v21 }
 0xab6   : > { %v1552_v18 = vpop.xlane.xlu0 %1551 }
 0xab7   : > { %v1561_v46 = vmul.f32 0.0625, %v1552_v18  ;;  %v1570_v48 = vmul.f32 %v1566_v45, %v1566_v45 }
 0xab9   : > { %v1565_v49 = vsub.f32 %v1542_v35, %v1561_v46  ;;  %v1578_v50 = vsel %vm631_vm1, %v1570_v48, 0.0 }
 0xaba   : > { %1579 = vadd.xlane.f32.xlu1 %v1578_v50  ;;  %v1558_v52 = vpop.xlane.xlu0 %1557 }
 0xabb   : > { %v1563_v53 = vmul.f32 0.0625, %v1558_v52  ;;  %v1569_v55 = vmul.f32 %v1565_v49, %v1565_v49 }
 0xabd   : > { %v1567_v56 = vsub.f32 %v1544_v37, %v1563_v53  ;;  %v1575_v40 = vsel %vm631_vm1, %v1569_v55, 0.0 }
 0xabe   : > { %1576 = vadd.xlane.f32.xlu0 %v1575_v40 }
 0xabf   : > { %v1571_v58 = vmul.f32 %v1567_v56, %v1567_v56 }
 0xac1   : > { %v1581_v59 = vsel %vm631_vm1, %v1571_v58, 0.0 }
 0xac2   : > { %1582 = vadd.xlane.f32.xlu0 %v1581_v59 }
 0xb39   : > { %v1574_v62 = vpop.xlane.xlu1 %1573 }
 0xb3a   : > { %v1584_v0 = vmul.f32 0.0625, %v1574_v62 }
 0xb3c   : > { %v1588_v1 = vadd.f32 1e-08, %v1584_v0 }
 0xb3e   : > { %2327 = vrsqrt.f32 %v1588_v1 }
 0xb47   : > { %v1580_v2 = vpop.xlane.xlu1 %1579 }
 0xb48   : > { %v1586_v43 = vmul.f32 0.0625, %v1580_v2  ;;  %v2328_v12 = vpop.eup %2327 }
 0xb49   : > { %v1596_v13 = vmul.f32 %v2328_v12, %v1564_v39 }
 0xb4a   : > { %v1590_v3 = vadd.f32 1e-08, %v1586_v43 }
 0xb4b   : > { %v1577_v4 = vpop.xlane.xlu0 %1576  ;;  %v1606_v57 = vmul.f32 %v2042_v16, %v1596_v13 }
 0xb4c   : > { %v1585_v5 = vmul.f32 0.0625, %v1577_v4  ;;  %2329 = vrsqrt.f32 %v1590_v3 }
 0xb4d   : > { %v1616_v28 = vadd.f32 %v2043_v54, %v1606_v57 }
 0xb4e   : > { %v1589_v6 = vadd.f32 1e-08, %v1585_v5 }
 0xb4f   : > { %v1583_v9 = vpop.xlane.xlu0 %1582  ;;  %vm1620_vm12 = vcmp.eq.f32.partialorder %v1616_v28, 0.0 }
 0xb50   : > { %2331 = vrsqrt.f32 %v1589_v6  ;;  %v1587_v10 = vmul.f32 0.0625, %v1583_v9 }
 0xb52   : > { %v1591_v11 = vadd.f32 1e-08, %v1587_v10 }
 0xb54   : > { %2333 = vrsqrt.f32 %v1591_v11 }
 0xb56   : > { %v2330_v14 = vpop.eup %2329 }
 0xb57   : > { %v1598_v51 = vmul.f32 %v2330_v14, %v1566_v45 }
 0xb59   : > { %v1608_v25 = vmul.f32 %v2042_v16, %v1598_v51 }
 0xb5a   : > { %v2332_v47 = vpop.eup %2331 }
 0xb5b   : > { %v1597_v20 = vmul.f32 %v2332_v47, %v1565_v49  ;;  %v1618_v7 = vadd.f32 %v2043_v54, %v1608_v25  ;;  %v2048_v49 = vld [vmem:[%s2897_s11] ss:$0 sm:$0xff] }
 0xb5d   : > { %v1607_v23 = vmul.f32 %v2042_v16, %v1597_v20  ;;  %vm1622_vm11 = vcmp.eq.f32.partialorder %v1618_v7, 0.0 }
 0xb5e   : > { %v2334_v24 = vpop.eup %2333 }
 0xb5f   : > { %v1599_v26 = vmul.f32 %v2334_v24, %v1567_v56  ;;  %v1617_v63 = vadd.f32 %v2043_v54, %v1607_v23 }
 0xb61   : > { %v1609_v29 = vmul.f32 %v2042_v16, %v1599_v26  ;;  %v1624_v19 = vpack.c.bf16 %v1617_v63, %v1616_v28  ;;  %vm1621_vm14 = vcmp.eq.f32.partialorder %v1617_v63, 0.0 }
 0xb63   : > { %2179 = vmatprep.mubr.msk.bf16.mxu0 %vm631_vm1, %v1624_v19  ;;  %v1619_v30 = vadd.f32 %v2043_v54, %v1609_v29 }
 0xb65   : > { %v1625_v61 = vpack.c.bf16 %v1619_v30, %v1618_v7  ;;  %vm1623_vm13 = vcmp.eq.f32.partialorder %v1619_v30, 0.0 }
 0xb67   : > { %2180 = vmatmul.mubr.msk.bf16.vlgmr.msra.gmra.mrb[28].mxu0 %vm631_vm1, %v1625_v61 }
 0xb68   : > { %2184 = vmatpush3.bf16.xpose.msra.mxu0 %v1729_v32 }
 0xc3a   : > { %v2181_v34 = vpop.f32.mrb[28].mxu0 }
 0xc3b   : > { %v1692_v22 = vadd.f32 %v2181_v34, %v2044_v33  ;;  %v1683_v35 = vpop.f32.mrb[29].mxu0 }
 0xc3c   : > { %v1684_v17 = vadd.f32 %v2044_v33, %v1683_v35  ;;  %v2182_v36 = vpop.f32.mrb[30].mxu0 }
 0xc3d   : > { %v1700_v37 = vsel %vm1622_vm11, 0.0, %v1692_v22  ;;  %v1695_v15 = vadd.f32 %v2182_v36, %v2044_v33  ;;  %v1686_v8 = vpop.f32.mrb[31].mxu0 }
 0xc3e   : > { %v1698_v38 = vsel %vm1620_vm12, 0.0, %v1684_v17  ;;  %v1687_v39 = vadd.f32 %v2044_v33, %v1686_v8  ;;  %v1704_v42 = vmax.f32 %v1700_v37, 0.0 }
 0xc3f   : > { %v1701_v41 = vsel %vm1623_vm13, 0.0, %v1695_v15  ;;  %v1702_v45 = vmax.f32 %v1698_v38, 0.0  ;;  %v2052_v38 = vld [vmem:[%s2898_s12] ss:$0 sm:$0xff] }
 0xc40   : > { %v1705_v44 = vmax.f32 %v1701_v41, 0.0  ;;  %v1699_v21 = vsel %vm1621_vm14, 0.0, %v1687_v39 }
 0xc41   : > { %v1703_v18 = vmax.f32 %v1699_v21, 0.0 }
 0xc42   : > { %v1707_v46 = vpack.c.bf16 %v1705_v44, %v1704_v42  ;;  %v2053_v42 = vld [vmem:[%s2899_s13] ss:$0 sm:$0xff] }
 0xc43   : > { %v1706_v48 = vpack.c.bf16 %v1703_v18, %v1702_v45 }
 0xc45   : > { %2185 = vmatprep.mubr.msk.bf16.mxu0 %vm631_vm1, %v1706_v48 }
 0xc46   : > { %2186 = vmatmul.mubr.msk.bf16.vlgmr.msra.gmra.mrb[32].mxu0 %vm631_vm1, %v1707_v46 }
 0xd19   : > { %v2187_v50 = vpop.f32.mrb[32].mxu0 }
 0xd1a   : > { %v1774_v52 = vadd.f32 %v2187_v50, %v2048_v49  ;;  %v1765_v53 = vpop.f32.mrb[33].mxu0 }
 0xd1b   : > { %v1766_v55 = vadd.f32 %v2048_v49, %v1765_v53  ;;  %v2188_v56 = vpop.f32.mrb[34].mxu0 }
 0xd1c   : > { %v1777_v40 = vadd.f32 %v2188_v56, %v2048_v49  ;;  %v1768_v58 = vpop.f32.mrb[35].mxu0  ;;  %v1782_v59 = vsel %vm1622_vm11, 0.0, %v1774_v52 }
 0xd1d   : > { %v1780_v60 = vsel %vm1620_vm12, 0.0, %v1766_v55  ;;  %v1769_v27 = vadd.f32 %v2048_v49, %v1768_v58  ;;  %v1786_v3 = vadd.f32 %v1782_v59, %v1618_v7 }
 0xd1e   : > { %v1784_v62 = vadd.f32 %v1780_v60, %v1616_v28  ;;  %v1783_v0 = vsel %vm1623_vm13, 0.0, %v1777_v40 }
 0xd1f   : > { %v1781_v1 = vsel %vm1621_vm14, 0.0, %v1769_v27  ;;  %v1787_v5 = vadd.f32 %v1783_v0, %v1619_v30  ;;  %v1796_v6 = vsel %vm631_vm1, %v1786_v3, 0.0 }
 0xd20   : > { %v1790_v2 = vsel %vm631_vm1, %v1784_v62, 0.0  ;;  %v1785_v43 = vadd.f32 %v1781_v1, %v1617_v63 }
 0xd21   : > { %1791 = vadd.xlane.f32.xlu1 %v1790_v2  ;;  %v1799_v9 = vsel %vm631_vm1, %v1787_v5, 0.0 }
 0xd22   : > { %v1793_v4 = vsel %vm631_vm1, %v1785_v43, 0.0 }
 0xd23   : > { %1794 = vadd.xlane.f32.xlu0 %v1793_v4 }
 0xd25   : > { %1797 = vadd.xlane.f32.xlu1 %v1796_v6 }
 0xd27   : > { %1800 = vadd.xlane.f32.xlu0 %v1799_v9 }
 0xdae   : > { %v1792_v10 = vpop.xlane.xlu1 %1791 }
 0xdaf   : > { %v1802_v11 = vmul.f32 0.0625, %v1792_v10 }
 0xdb0   : > { %v1795_v12 = vpop.xlane.xlu0 %1794 }
 0xdb1   : > { %v1806_v13 = vsub.f32 %v1784_v62, %v1802_v11  ;;  %v1803_v14 = vmul.f32 0.0625, %v1795_v12 }
 0xdb2   : > { %v1798_v16 = vpop.xlane.xlu1 %1797 }
 0xdb3   : > { %v1807_v47 = vsub.f32 %v1785_v43, %v1803_v14  ;;  %v1804_v51 = vmul.f32 0.0625, %v1798_v16  ;;  %v1810_v20 = vmul.f32 %v1806_v13, %v1806_v13 }
 0xdb4   : > { %v1801_v57 = vpop.xlane.xlu0 %1800 }
 0xdb5   : > { %v1808_v54 = vsub.f32 %v1786_v3, %v1804_v51  ;;  %v1805_v23 = vmul.f32 0.0625, %v1801_v57  ;;  %v1814_v24 = vsel %vm631_vm1, %v1810_v20, 0.0  ;;  %v1811_v25 = vmul.f32 %v1807_v47, %v1807_v47 }
 0xdb6   : > { %1815 = vadd.xlane.f32.xlu1 %v1814_v24 }
 0xdb7   : > { %v1809_v26 = vsub.f32 %v1787_v5, %v1805_v23  ;;  %v1817_v28 = vsel %vm631_vm1, %v1811_v25, 0.0  ;;  %v1812_v63 = vmul.f32 %v1808_v54, %v1808_v54 }
 0xdb8   : > { %1818 = vadd.xlane.f32.xlu0 %v1817_v28 }
 0xdb9   : > { %v1820_v29 = vsel %vm631_vm1, %v1812_v63, 0.0  ;;  %v1813_v19 = vmul.f32 %v1809_v26, %v1809_v26 }
 0xdba   : > { %1821 = vadd.xlane.f32.xlu1 %v1820_v29 }
 0xdbb   : > { %v1823_v7 = vsel %vm631_vm1, %v1813_v19, 0.0 }
 0xdbc   : > { %1824 = vadd.xlane.f32.xlu0 %v1823_v7 }
 0xe43   : > { %v1816_v30 = vpop.xlane.xlu1 %1815 }
 0xe44   : > { %v1826_v61 = vmul.f32 0.0625, %v1816_v30 }
 0xe45   : > { %v1819_v31 = vpop.xlane.xlu0 %1818 }
 0xe46   : > { %v1830_v32 = vadd.f32 1e-08, %v1826_v61  ;;  %v1827_v33 = vmul.f32 0.0625, %v1819_v31 }
 0xe47   : > { %v1822_v34 = vpop.xlane.xlu1 %1821 }
 0xe48   : > { %2335 = vrsqrt.f32 %v1830_v32  ;;  %v1831_v22 = vadd.f32 1e-08, %v1827_v33  ;;  %v1828_v35 = vmul.f32 0.0625, %v1822_v34 }
 0xe49   : > { %v1825_v17 = vpop.xlane.xlu0 %1824 }
 0xe4a   : > { %2337 = vrsqrt.f32 %v1831_v22  ;;  %v1832_v36 = vadd.f32 1e-08, %v1828_v35  ;;  %v1829_v37 = vmul.f32 0.0625, %v1825_v17 }
 0xe4c   : > { %2339 = vrsqrt.f32 %v1832_v36  ;;  %v1833_v15 = vadd.f32 1e-08, %v1829_v37 }
 0xe4e   : > { %2341 = vrsqrt.f32 %v1833_v15 }
 0xe52   : > { %v2336_v8 = vpop.eup %2335 }
 0xe53   : > { %v1838_v39 = vmul.f32 %v2336_v8, %v1806_v13 }
 0xe54   : > { %v2338_v41 = vpop.eup %2337 }
 0xe55   : > { %v1848_v44 = vmul.f32 %v2052_v38, %v1838_v39  ;;  %v1839_v21 = vmul.f32 %v2338_v41, %v1807_v47 }
 0xe56   : > { %v2340_v45 = vpop.eup %2339 }
 0xe57   : > { %v1858_v18 = vadd.f32 %v2053_v42, %v1848_v44  ;;  %v1849_v46 = vmul.f32 %v2052_v38, %v1839_v21  ;;  %v1840_v48 = vmul.f32 %v2340_v45, %v1808_v54 }
 0xe58   : > { %v2342_v49 = vpop.eup %2341 }
 0xe59   : > { %v1859_v50 = vadd.f32 %v2053_v42, %v1849_v46  ;;  %v1850_v52 = vmul.f32 %v2052_v38, %v1840_v48  ;;  %v1841_v53 = vmul.f32 %v2342_v49, %v1809_v26  ;;  %1862 = vst.msk [vmem:[%s524_s19] sm:$0xff] %vm631_vm1, %v1858_v18 }
 0xe5b   : > { %v1860_v55 = vadd.f32 %v2053_v42, %v1850_v52  ;;  %v1851_v56 = vmul.f32 %v2052_v38, %v1841_v53  ;;  %1863 = vst.msk [vmem:[%s524_s19 + $0x8] sm:$0xff] %vm631_vm1, %v1859_v50 }
 0xe5d   : > { %v1861_v40 = vadd.f32 %v2053_v42, %v1851_v56  ;;  %1864 = vst.msk [vmem:[%s524_s19 + $0x10] sm:$0xff] %vm631_vm1, %v1860_v55 }
 0xe5f   : > { %1865 = vst.msk [vmem:[%s524_s19 + $0x18] sm:$0xff] %vm631_vm1, %v1861_v40 }
 0xe60   : > { %2356 = shalt.err (!%p2353_p5)
}
 0xe61   : > { %s2357_s21 = scalar_lea.hbm %s2834_s15, 512  ;;  %s2361_s20 = scalar_lea.hbm %s2900_s14, 1024 }
 0xe62   : > { %p2358_p6 = scmp.ne.s32.totalorder %s2834_s15, %s2357_s21  ;;  %p2362_p10 = scmp.lt.u32.totalorder %s2834_s15, %s2900_s14 }
 0xe63   : > { %p2363_p11 = scmp.lt.u32.totalorder %s2361_s20, %s2357_s21  ;;  %p2365_p13 = scmp.lt.u32.totalorder %s2357_s21, %s2834_s15 }
 0xe64   : > { %p2359_p7 = pnand %p2358_p6, %p2548_p4 }
 0xe65   : > { %p2364_p12 = por %p2363_p11, %p2362_p10 }
 0xe66   : > { %p2360_p9 = pneg %p2359_p7 }
 0xe67   : > { %p2366_p0 = por %p2365_p13, %p2364_p12 }
 0xe69   : > { %p2367_p1 = pnand %p2366_p0, %p2360_p9 }
 0xe6b   : > { %2370 = shalt.err (!%p2367_p1)
}
 0xe6c   : > { %s2431_s25 = smov 128   ;;  %s2432_s26 = smov 8  }
 0xe6d   : > { %2202 = dma.vmem_to_hbm [thread:$0]  (%p2548_p4), %s2836_s17, 512, %s2834_s15, %s2840_s16, %s2431_s25, %s2431_s25, %s2432_s26  }
 0xe6e PF: > { %s2914_s22 = sld [smem:[#allocation9_spill]]  ;;  %p2208_p2 = scmp.ge.s32.totalorder %s2421_s18, 2 }
 0xe70   : > { %p2205_p3 = pnand %p2208_p2, %p2555_p8 }
 0xe74   : > { %s1897_s28 = sand.u32 1, %s2914_s22  }
 0xe75   : > { %s1898_s21 = scalar_lea.sflag [#allocation7], %s1897_s28 }
 0xe76   : > { %2396 = dma.done.wait (!%p2205_p3), %s1898_s21, 512  }
 0xe77   : > { %2398 = vsyncadd (!%p2205_p3), %s1898_s21, 4294966784  ;;  %s27_s18 = sadd.s32 1, %s2421_s18   ;;  %s2916_s19 = sld [smem:[#allocation10_spill]] }
 0xe78   : > { %p24_p5 = scmp.ge.s32.totalorder %s27_s18, 4   ;;  %s2917_s15 = sld [smem:[#allocation14_spill]] }
 0xe79   : > { %s2918_s16 = sld [smem:[#allocation11_spill]]  ;;  %s2919_s17 = sld [smem:[#allocation12_spill]] }
 0xe7a   : > { %s2920_s29 = smov %s2405_s30  ;;  %26 = sbr.rel (!%p24_p5) target bundleno = 4 (0x4), region = 130 }
 0xe7d   : > { %s2921_s30 = smov %s2916_s19 }
 0xe81   :  { %1903 = vsyncpa [#allocation7], 1 }
 0xe82   :  { %1905 = vsyncpa [#allocation7 + $0x1], 1 }

</bundles_post_ra>
